<compile_context>
chip_gen: v7x
topology: tpu7x:2x2x1
jax: 0.10.0
libtpu: 0.0.40
codegen_flags: <defaults>
</compile_context>

<pallas_src>
import functools

import jax
import jax.numpy as jnp
from jax.experimental import pallas as pl
from jax.experimental.pallas import tpu as pltpu

LANE = 128  # TPU lane width: all feature / class dims padded to this


def _round_up(v, m):
    return ((v + m - 1) // m) * m


def _hw_config():
    """Generation-aware tiling / VMEM settings.

    v5e / v6e: 128 MiB VMEM -> big fused-path threshold, big K tiles.
    v7x: 64 MiB VMEM per TensorCore -> tighter caps, prefer the 2-TC tiled
    path earlier (the fused grid=(1,) kernel runs on a single core).
    """
    vmem_bytes = 64 * 1024 * 1024
    try:
        info = pltpu.get_tpu_info()
        vmem_bytes = int(getattr(info, "vmem_capacity_bytes", vmem_bytes))
    except Exception:
        pass
    if vmem_bytes >= 96 * 1024 * 1024:  # v5e / v6e (128 MiB physical VMEM)
        return dict(vmem_limit=100 * 1024 * 1024,
                    fused_max_nodes=3072,
                    row_tile=512,
                    k_tile_max=2048)
    # v7x (64 MiB per TC)
    return dict(vmem_limit=52 * 1024 * 1024,
                fused_max_nodes=2048,
                row_tile=512,
                k_tile_max=1024)


def _pick_tk(n_pad, tm, tk_max):
    """Largest K-tile that is a multiple of tm, divides n_pad, and <= tk_max."""
    tk = min(tm, n_pad)
    cand = tk
    while cand * 2 <= min(tk_max, n_pad) and n_pad % (cand * 2) == 0:
        cand *= 2
        tk = cand
    return tk


def _masked_log_softmax(logits, num_classes):
    """Numerically stable log_softmax over the last axis, ignoring padded
    class columns (col >= num_classes)."""
    col = jax.lax.broadcasted_iota(jnp.int32, logits.shape, 1)
    valid = col < num_classes
    masked = jnp.where(valid, logits, -1e30)
    m = jnp.max(masked, axis=-1, keepdims=True)
    s = masked - m
    e = jnp.where(valid, jnp.exp(s), 0.0)
    lse = jnp.log(jnp.sum(e, axis=-1, keepdims=True))
    return s - lse


# ---------------------------------------------------------------------------
# Fused path (small graphs): all 4 GCN layers in a single pallas_call,
# A_hat DMA'd to VMEM once and reused for every layer.
# ---------------------------------------------------------------------------
def _gcn_fused_kernel(a_ref, x_ref, w1, b1, w2, b2, w3, b3, w4, b4,
                      o_ref, *, num_classes):
    a = a_ref[...]                           # (Np, Np) bf16, loaded once
    h = x_ref[...]                           # (Np, F0p) bf16

    def layer(h_bf, w_ref, b_ref):
        xw = jnp.dot(h_bf, w_ref[...], preferred_element_type=jnp.float32)
        out = jnp.dot(a, xw.astype(jnp.bfloat16),
                      preferred_element_type=jnp.float32)
        return out + b_ref[...]              # f32

    h = jnp.maximum(layer(h, w1, b1), 0.0).astype(jnp.bfloat16)
    h = jnp.maximum(layer(h, w2, b2), 0.0).astype(jnp.bfloat16)
    h = jnp.maximum(layer(h, w3, b3), 0.0).astype(jnp.bfloat16)
    logits = layer(h, w4, b4)                # f32
    o_ref[...] = _masked_log_softmax(logits, num_classes).astype(o_ref.dtype)


def _gcn1_fused(a_p, x_p, params_p, num_classes, *, vmem_limit):
    n_pad = a_p.shape[0]
    c_pad = params_p[-1][0].shape[1]
    flat = [a_p, x_p]
    in_specs = [
        pl.BlockSpec((n_pad, n_pad), lambda i: (0, 0)),
        pl.BlockSpec((n_pad, x_p.shape[1]), lambda i: (0, 0)),
    ]
    for w, b in params_p:
        flat += [w, b]
        in_specs += [pl.BlockSpec(w.shape, lambda i: (0, 0)),
                     pl.BlockSpec(b.shape, lambda i: (0, 0))]
    kernel = functools.partial(_gcn_fused_kernel, num_classes=num_classes)
    return pl.pallas_call(
        kernel,
        out_shape=jax.ShapeDtypeStruct((n_pad, c_pad), jnp.float32),
        grid=(1,),
        in_specs=in_specs,
        out_specs=pl.BlockSpec((n_pad, c_pad), lambda i: (0, 0)),
        compiler_params=pltpu.CompilerParams(
            dimension_semantics=("arbitrary",),
            vmem_limit_bytes=vmem_limit),
    )(*flat)


# ---------------------------------------------------------------------------
# Tiled path (large graphs): ONE kernel per layer computing
#   out_rowtile = relu_or_logsoftmax( (A_rowtile @ H) @ W + b )
# with the A @ H contraction K-tiled over an f32 VMEM accumulator.
# ---------------------------------------------------------------------------
def _gcn_layer_kernel(a_ref, h_ref, w_ref, b_ref, o_ref, acc_ref, *,
                      apply_relu, apply_log_softmax, num_classes):
    @pl.when(pl.program_id(1) == 0)
    def _():
        acc_ref[...] = jnp.zeros_like(acc_ref)

    acc_ref[...] += jnp.dot(a_ref[...], h_ref[...],
                            preferred_element_type=jnp.float32)

    @pl.when(pl.program_id(1) == pl.num_programs(1) - 1)
    def _():
        # Associativity folds X@W into this kernel: (A @ H) @ W + b.
        out = jnp.dot(acc_ref[...].astype(jnp.bfloat16), w_ref[...],
                      preferred_element_type=jnp.float32) + b_ref[...]
        if apply_relu:
            out = jnp.maximum(out, 0.0)
        if apply_log_softmax:
            out = _masked_log_softmax(out, num_classes)
        o_ref[...] = out.astype(o_ref.dtype)


def _gcn_layer(a_p, h_p, w_p, b_p, *, tm, tk, apply_relu, apply_log_softmax,
               num_classes, out_dtype, vmem_limit):
    n_pad = a_p.shape[0]
    f_in = h_p.shape[1]
    f_out = w_p.shape[1]
    kernel = functools.partial(_gcn_layer_kernel,
                               apply_relu=apply_relu,
                               apply_log_softmax=apply_log_softmax,
                               num_classes=num_classes)
    return pl.pallas_call(
        kernel,
        out_shape=jax.ShapeDtypeStruct((n_pad, f_out), out_dtype),
        grid=(n_pad // tm, n_pad // tk),
        in_specs=[
            pl.BlockSpec((tm, tk), lambda i, k: (i, k)),       # A_hat tile
            pl.BlockSpec((tk, f_in), lambda i, k: (k, 0)),     # H (K tile)
            pl.BlockSpec((f_in, f_out), lambda i, k: (0, 0)),  # W resident
            pl.BlockSpec((1, f_out), lambda i, k: (0, 0)),     # bias resident
        ],
        out_specs=pl.BlockSpec((tm, f_out), lambda i, k: (i, 0)),
        scratch_shapes=[pltpu.VMEM((tm, f_in), jnp.float32)],
        compiler_params=pltpu.CompilerParams(
            dimension_semantics=("parallel", "arbitrary"),
            vmem_limit_bytes=vmem_limit),
    )(a_p, h_p, w_p, b_p)


# ---------------------------------------------------------------------------
# One-time prep (hoisted out of the per-forward path) + forward pass
# ---------------------------------------------------------------------------
def build_normalized_adjacency_padded(edge_index, num_nodes, n_pad):
    """Padded dense A_hat = D^{-1/2}(A+I)D^{-1/2} as bf16; padded rows/cols 0.

    Built once per graph (not per forward).  Duplicate edges are counted with
    multiplicity and directed edge_index is not symmetrized (raw message
    passing; matches the previous implementation).
    """
    src, dst = edge_index[0], edge_index[1]
    a = jnp.zeros((n_pad, n_pad), jnp.float32)
    a = a.at[src, dst].add(1.0)                       # directed edges, weight 1
    idx = jnp.arange(num_nodes)
    a = a.at[idx, idx].add(1.0)                       # self-loops on valid nodes
    deg = jnp.sum(a, axis=1)
    dinv = jnp.where(deg > 0, 1.0 / jnp.sqrt(deg), 0.0)
    return (dinv[:, None] * a * dinv[None, :]).astype(jnp.bfloat16)


def prepare_gcn1(params, x, edge_index, num_nodes, num_classes, cfg):
    """Pad/cast A_hat, X and weights once (lane-padded, bf16 MXU operands)."""
    fused = num_nodes <= cfg["fused_max_nodes"]
    n_pad = _round_up(num_nodes, LANE if fused else cfg["row_tile"])

    a_p = build_normalized_adjacency_padded(edge_index, num_nodes, n_pad)

    params_p = []
    for w, b in params:
        f_in, f_out = w.shape
        w_p = jnp.zeros((_round_up(f_in, LANE), _round_up(f_out, LANE)),
                        jnp.bfloat16).at[:f_in, :f_out].set(w.astype(jnp.bfloat16))
        b_p = jnp.zeros((1, _round_up(f_out, LANE)),
                        jnp.float32).at[0, :f_out].set(b.astype(jnp.float32))
        params_p.append((w_p, b_p))

    f0 = x.shape[1]
    x_p = jnp.zeros((n_pad, params_p[0][0].shape[0]), jnp.bfloat16)
    x_p = x_p.at[:num_nodes, :f0].set(x.astype(jnp.bfloat16))

    return dict(a=a_p, x=x_p, params=params_p, n=num_nodes, n_pad=n_pad,
                fused=fused, num_classes=num_classes)


def gcn1_forward(prep, cfg):
    n, n_pad, nc = prep["n"], prep["n_pad"], prep["num_classes"]
    if prep["fused"]:
        out_p = _gcn1_fused(prep["a"], prep["x"], prep["params"], nc,
                            vmem_limit=cfg["vmem_limit"])
    else:
        tm = min(cfg["row_tile"], n_pad)
        tk = _pick_tk(n_pad, tm, cfg["k_tile_max"])
        h = prep["x"]
        n_layers = len(prep["params"])
        for li, (w_p, b_p) in enumerate(prep["params"]):
            last = li == n_layers - 1
            h = _gcn_layer(prep["a"], h, w_p, b_p, tm=tm, tk=tk,
                           apply_relu=not last, apply_log_softmax=last,
                           num_classes=nc,
                           out_dtype=jnp.float32 if last else jnp.bfloat16,
                           vmem_limit=cfg["vmem_limit"])
        out_p = h
    return out_p[:n, :nc]


# ---------------------------------------------------------------------------
# Parameter construction + pure-f32 reference (JAX glue, outside kernels)
# ---------------------------------------------------------------------------
def glorot(key, shape):
    fan_in, fan_out = shape
    limit = jnp.sqrt(6.0 / (fan_in + fan_out))
    return jax.random.uniform(key, shape, jnp.float32, -limit, limit)


def init_gcn1_params(key, num_node_features, num_classes):
    dims = [num_node_features, 64, 128, 64, num_classes]
    params = []
    for i in range(4):
        key, kw, kb = jax.random.split(key, 3)
        w = glorot(kw, (dims[i], dims[i + 1]))
        b = 0.01 * jax.random.normal(kb, (dims[i + 1],), jnp.float32)
        params.append((w, b))
    return params


def _build_a_hat_f32(edge_index, num_nodes):
    src, dst = edge_index[0], edge_index[1]
    a = jnp.zeros((num_nodes, num_nodes), jnp.float32)
    a = a.at[src, dst].add(1.0)
    a = a + jnp.eye(num_nodes, dtype=jnp.float32)
    deg = jnp.sum(a, axis=1)
    dinv = jnp.where(deg > 0, 1.0 / jnp.sqrt(deg), 0.0)
    return dinv[:, None] * a * dinv[None, :]


def _reference_forward(params, x, a_hat):
    """Pure-f32 reference of GCN1's forward (kernels run bf16 MXU operands,
    hence the looser 5e-2 tolerance below)."""
    h = x
    out = None
    for li, (w, b) in enumerate(params):
        out = a_hat @ (h @ w) + b[None, :]
        if li < len(params) - 1:
            h = jnp.maximum(out, 0.0)
        else:
            out = jax.nn.log_softmax(out, axis=1)
    return out


if __name__ == "__main__":
    NUM_NODES = 32
    NUM_NODE_FEATURES = 16
    NUM_CLASSES = 8
    NUM_EDGES = 64

    key = jax.random.PRNGKey(0)
    k_x, k_e, k_p, k_x2, k_e2 = jax.random.split(key, 5)

    cfg = _hw_config()
    params = init_gcn1_params(k_p, NUM_NODE_FEATURES, NUM_CLASSES)

    # --- small graph -> fused single-kernel path ----------------------------
    x = jax.random.normal(k_x, (NUM_NODES, NUM_NODE_FEATURES), jnp.float32)
    edge_index = jax.random.randint(k_e, (2, NUM_EDGES), 0, NUM_NODES,
                                    dtype=jnp.int32)
    prep = prepare_gcn1(params, x, edge_index, NUM_NODES, NUM_CLASSES, cfg)
    out = jax.block_until_ready(gcn1_forward(prep, cfg))

    ref = _reference_forward(params, x, _build_a_hat_f32(edge_index, NUM_NODES))
    assert out.shape == (NUM_NODES, NUM_CLASSES)
    assert jnp.allclose(out, ref, atol=5e-2, rtol=5e-2), \
        float(jnp.max(jnp.abs(out - ref)))

    # --- larger graph -> K-tiled, row-parallel fused-layer path -------------
    # Test-local config forces the tiled path with multiple row and K steps so
    # the accumulator / pl.when phases are exercised at small shapes.
    N2, E2 = 512, 2048
    x2 = jax.random.normal(k_x2, (N2, NUM_NODE_FEATURES), jnp.float32)
    e2 = jax.random.randint(k_e2, (2, E2), 0, N2, dtype=jnp.int32)

    cfg2 = dict(cfg, fused_max_nodes=0, row_tile=256, k_tile_max=256)
    prep2 = prepare_gcn1(params, x2, e2, N2, NUM_CLASSES, cfg2)
    out2 = jax.block_until_ready(gcn1_forward(prep2, cfg2))

    ref2 = _reference_forward(params, x2, _build_a_hat_f32(e2, N2))
    assert out2.shape == (N2, NUM_CLASSES)
    assert jnp.allclose(out2, ref2, atol=5e-2, rtol=5e-2), \
        float(jnp.max(jnp.abs(out2 - ref2)))

    print("KERNEL_OK")
</pallas_src>

<mosaic_0001>
module attributes {stable_mosaic.version = 11 : i64} {
  func.func @_gcn_fused_kernel(%arg0: i32, %arg1: memref<128x128xbf16, #tpu.memory_space<vmem>>, %arg2: memref<128x128xbf16, #tpu.memory_space<vmem>>, %arg3: memref<128x128xbf16, #tpu.memory_space<vmem>>, %arg4: memref<1x128xf32, #tpu.memory_space<vmem>>, %arg5: memref<128x128xbf16, #tpu.memory_space<vmem>>, %arg6: memref<1x128xf32, #tpu.memory_space<vmem>>, %arg7: memref<128x128xbf16, #tpu.memory_space<vmem>>, %arg8: memref<1x128xf32, #tpu.memory_space<vmem>>, %arg9: memref<128x128xbf16, #tpu.memory_space<vmem>>, %arg10: memref<1x128xf32, #tpu.memory_space<vmem>>, %arg11: memref<128x128xf32, #tpu.memory_space<vmem>>) attributes {dimension_semantics = [#tpu.dimension_semantics<arbitrary>], iteration_bounds = array<i64: 1>, scalar_prefetch = 0 : i64, scratch_operands = 0 : i64, tpu.core_type = #tpu.core_type<tc>, window_params = [{pipeline_mode = #tpu.pipeline_mode<synchronous>, transform_indices = @transform_0, window_bounds = array<i64: 128, 128>}, {pipeline_mode = #tpu.pipeline_mode<synchronous>, transform_indices = @transform_1, window_bounds = array<i64: 128, 128>}, {pipeline_mode = #tpu.pipeline_mode<synchronous>, transform_indices = @transform_2, window_bounds = array<i64: 128, 128>}, {pipeline_mode = #tpu.pipeline_mode<synchronous>, transform_indices = @transform_3, window_bounds = array<i64: 1, 128>}, {pipeline_mode = #tpu.pipeline_mode<synchronous>, transform_indices = @transform_4, window_bounds = array<i64: 128, 128>}, {pipeline_mode = #tpu.pipeline_mode<synchronous>, transform_indices = @transform_5, window_bounds = array<i64: 1, 128>}, {pipeline_mode = #tpu.pipeline_mode<synchronous>, transform_indices = @transform_6, window_bounds = array<i64: 128, 128>}, {pipeline_mode = #tpu.pipeline_mode<synchronous>, transform_indices = @transform_7, window_bounds = array<i64: 1, 128>}, {pipeline_mode = #tpu.pipeline_mode<synchronous>, transform_indices = @transform_8, window_bounds = array<i64: 128, 128>}, {pipeline_mode = #tpu.pipeline_mode<synchronous>, transform_indices = @transform_9, window_bounds = array<i64: 1, 128>}, {pipeline_mode = #tpu.pipeline_mode<synchronous>, transform_indices = @transform_10, window_bounds = array<i64: 128, 128>}]} {
    %c0 = arith.constant 0 : index
    %c0_0 = arith.constant 0 : index
    %0 = vector.load %arg1[%c0, %c0_0] : memref<128x128xbf16, #tpu.memory_space<vmem>>, vector<128x128xbf16>
    %c0_1 = arith.constant 0 : index
    %c0_2 = arith.constant 0 : index
    %1 = vector.load %arg2[%c0_1, %c0_2] : memref<128x128xbf16, #tpu.memory_space<vmem>>, vector<128x128xbf16>
    %c0_3 = arith.constant 0 : index
    %c0_4 = arith.constant 0 : index
    %2 = vector.load %arg3[%c0_3, %c0_4] : memref<128x128xbf16, #tpu.memory_space<vmem>>, vector<128x128xbf16>
    %cst = arith.constant dense<0.000000e+00> : vector<128x128xf32>
    %3 = tpu.matmul %1, %2, %cst {dimension_numbers = #tpu.dot_dimension_numbers<[1], [0], [0], [1], [0, 0, 1, 1], [], []>} : vector<128x128xbf16>, vector<128x128xbf16>, vector<128x128xf32> -> vector<128x128xf32>
    %4 = arith.truncf %3 : vector<128x128xf32> to vector<128x128xbf16>
    %cst_5 = arith.constant dense<0.000000e+00> : vector<128x128xf32>
    %5 = tpu.matmul %0, %4, %cst_5 {dimension_numbers = #tpu.dot_dimension_numbers<[1], [0], [0], [1], [0, 0, 1, 1], [], []>} : vector<128x128xbf16>, vector<128x128xbf16>, vector<128x128xf32> -> vector<128x128xf32>
    %c0_6 = arith.constant 0 : index
    %c0_7 = arith.constant 0 : index
    %6 = vector.load %arg4[%c0_6, %c0_7] : memref<1x128xf32, #tpu.memory_space<vmem>>, vector<1x128xf32>
    %7 = vector.broadcast %6 : vector<1x128xf32> to vector<128x128xf32>
    %8 = arith.addf %5, %7 : vector<128x128xf32>
    %cst_8 = arith.constant 0.000000e+00 : f32
    %9 = vector.broadcast %cst_8 : f32 to vector<128x128xf32>
    %10 = arith.maximumf %8, %9 : vector<128x128xf32>
    %11 = arith.truncf %10 : vector<128x128xf32> to vector<128x128xbf16>
    %c0_9 = arith.constant 0 : index
    %c0_10 = arith.constant 0 : index
    %12 = vector.load %arg5[%c0_9, %c0_10] : memref<128x128xbf16, #tpu.memory_space<vmem>>, vector<128x128xbf16>
    %cst_11 = arith.constant dense<0.000000e+00> : vector<128x128xf32>
    %13 = tpu.matmul %11, %12, %cst_11 {dimension_numbers = #tpu.dot_dimension_numbers<[1], [0], [0], [1], [0, 0, 1, 1], [], []>} : vector<128x128xbf16>, vector<128x128xbf16>, vector<128x128xf32> -> vector<128x128xf32>
    %14 = arith.truncf %13 : vector<128x128xf32> to vector<128x128xbf16>
    %cst_12 = arith.constant dense<0.000000e+00> : vector<128x128xf32>
    %15 = tpu.matmul %0, %14, %cst_12 {dimension_numbers = #tpu.dot_dimension_numbers<[1], [0], [0], [1], [0, 0, 1, 1], [], []>} : vector<128x128xbf16>, vector<128x128xbf16>, vector<128x128xf32> -> vector<128x128xf32>
    %c0_13 = arith.constant 0 : index
    %c0_14 = arith.constant 0 : index
    %16 = vector.load %arg6[%c0_13, %c0_14] : memref<1x128xf32, #tpu.memory_space<vmem>>, vector<1x128xf32>
    %17 = vector.broadcast %16 : vector<1x128xf32> to vector<128x128xf32>
    %18 = arith.addf %15, %17 : vector<128x128xf32>
    %cst_15 = arith.constant 0.000000e+00 : f32
    %19 = vector.broadcast %cst_15 : f32 to vector<128x128xf32>
    %20 = arith.maximumf %18, %19 : vector<128x128xf32>
    %21 = arith.truncf %20 : vector<128x128xf32> to vector<128x128xbf16>
    %c0_16 = arith.constant 0 : index
    %c0_17 = arith.constant 0 : index
    %22 = vector.load %arg7[%c0_16, %c0_17] : memref<128x128xbf16, #tpu.memory_space<vmem>>, vector<128x128xbf16>
    %cst_18 = arith.constant dense<0.000000e+00> : vector<128x128xf32>
    %23 = tpu.matmul %21, %22, %cst_18 {dimension_numbers = #tpu.dot_dimension_numbers<[1], [0], [0], [1], [0, 0, 1, 1], [], []>} : vector<128x128xbf16>, vector<128x128xbf16>, vector<128x128xf32> -> vector<128x128xf32>
    %24 = arith.truncf %23 : vector<128x128xf32> to vector<128x128xbf16>
    %cst_19 = arith.constant dense<0.000000e+00> : vector<128x128xf32>
    %25 = tpu.matmul %0, %24, %cst_19 {dimension_numbers = #tpu.dot_dimension_numbers<[1], [0], [0], [1], [0, 0, 1, 1], [], []>} : vector<128x128xbf16>, vector<128x128xbf16>, vector<128x128xf32> -> vector<128x128xf32>
    %c0_20 = arith.constant 0 : index
    %c0_21 = arith.constant 0 : index
    %26 = vector.load %arg8[%c0_20, %c0_21] : memref<1x128xf32, #tpu.memory_space<vmem>>, vector<1x128xf32>
    %27 = vector.broadcast %26 : vector<1x128xf32> to vector<128x128xf32>
    %28 = arith.addf %25, %27 : vector<128x128xf32>
    %cst_22 = arith.constant 0.000000e+00 : f32
    %29 = vector.broadcast %cst_22 : f32 to vector<128x128xf32>
    %30 = arith.maximumf %28, %29 : vector<128x128xf32>
    %31 = arith.truncf %30 : vector<128x128xf32> to vector<128x128xbf16>
    %c0_23 = arith.constant 0 : index
    %c0_24 = arith.constant 0 : index
    %32 = vector.load %arg9[%c0_23, %c0_24] : memref<128x128xbf16, #tpu.memory_space<vmem>>, vector<128x128xbf16>
    %cst_25 = arith.constant dense<0.000000e+00> : vector<128x128xf32>
    %33 = tpu.matmul %31, %32, %cst_25 {dimension_numbers = #tpu.dot_dimension_numbers<[1], [0], [0], [1], [0, 0, 1, 1], [], []>} : vector<128x128xbf16>, vector<128x128xbf16>, vector<128x128xf32> -> vector<128x128xf32>
    %34 = arith.truncf %33 : vector<128x128xf32> to vector<128x128xbf16>
    %cst_26 = arith.constant dense<0.000000e+00> : vector<128x128xf32>
    %35 = tpu.matmul %0, %34, %cst_26 {dimension_numbers = #tpu.dot_dimension_numbers<[1], [0], [0], [1], [0, 0, 1, 1], [], []>} : vector<128x128xbf16>, vector<128x128xbf16>, vector<128x128xf32> -> vector<128x128xf32>
    %c0_27 = arith.constant 0 : index
    %c0_28 = arith.constant 0 : index
    %36 = vector.load %arg10[%c0_27, %c0_28] : memref<1x128xf32, #tpu.memory_space<vmem>>, vector<1x128xf32>
    %37 = vector.broadcast %36 : vector<1x128xf32> to vector<128x128xf32>
    %38 = arith.addf %35, %37 : vector<128x128xf32>
    %39 = tpu.iota {dimensions = array<i32: 1>} : vector<128x128xi32>
    %c8_i32 = arith.constant 8 : i32
    %40 = vector.broadcast %c8_i32 : i32 to vector<128x128xi32>
    %41 = arith.cmpi slt, %39, %40 : vector<128x128xi32>
    %cst_29 = arith.constant -1.000000e+30 : f32
    %42 = vector.broadcast %cst_29 : f32 to vector<128x128xf32>
    %43 = arith.select %41, %38, %42 : vector<128x128xi1>, vector<128x128xf32>
    %cst_30 = arith.constant dense<0xFF800000> : vector<128xf32>
    %44 = vector.multi_reduction <maximumf>, %43, %cst_30 [1] : vector<128x128xf32> to vector<128xf32>
    %45 = vector.shape_cast %44 : vector<128xf32> to vector<128x1xf32>
    %46 = vector.broadcast %45 : vector<128x1xf32> to vector<128x128xf32>
    %47 = arith.subf %43, %46 : vector<128x128xf32>
    %48 = math.exp %47 : vector<128x128xf32>
    %cst_31 = arith.constant 0.000000e+00 : f32
    %49 = vector.broadcast %cst_31 : f32 to vector<128x128xf32>
    %50 = arith.select %41, %48, %49 : vector<128x128xi1>, vector<128x128xf32>
    %cst_32 = arith.constant dense<0.000000e+00> : vector<128xf32>
    %51 = vector.multi_reduction <add>, %50, %cst_32 [1] : vector<128x128xf32> to vector<128xf32>
    %52 = vector.shape_cast %51 : vector<128xf32> to vector<128x1xf32>
    %53 = math.log %52 : vector<128x1xf32>
    %54 = vector.broadcast %53 : vector<128x1xf32> to vector<128x128xf32>
    %55 = arith.subf %47, %54 : vector<128x128xf32>
    %c0_33 = arith.constant 0 : index
    %c0_34 = arith.constant 0 : index
    %56 = vector.load %arg11[%c0_33, %c0_34] : memref<128x128xf32, #tpu.memory_space<vmem>>, vector<128x128xf32>
    tpu.vector_store %arg11[%c0_33, %c0_34], %55 {strides = array<i32>} : memref<128x128xf32, #tpu.memory_space<vmem>>, vector<128x128xf32>,
    return
  }
  func.func @transform_0(%arg0: i32) -> (i32, i32) {
    %c0_i32 = arith.constant 0 : i32
    %c0_i32_0 = arith.constant 0 : i32
    %c0_i32_1 = arith.constant 0 : i32
    return %c0_i32, %c0_i32_0 : i32, i32
  }
  func.func @transform_1(%arg0: i32) -> (i32, i32) {
    %c0_i32 = arith.constant 0 : i32
    %c0_i32_0 = arith.constant 0 : i32
    %c0_i32_1 = arith.constant 0 : i32
    return %c0_i32, %c0_i32_0 : i32, i32
  }
  func.func @transform_2(%arg0: i32) -> (i32, i32) {
    %c0_i32 = arith.constant 0 : i32
    %c0_i32_0 = arith.constant 0 : i32
    %c0_i32_1 = arith.constant 0 : i32
    return %c0_i32, %c0_i32_0 : i32, i32
  }
  func.func @transform_3(%arg0: i32) -> (i32, i32) {
    %c0_i32 = arith.constant 0 : i32
    %c0_i32_0 = arith.constant 0 : i32
    %c0_i32_1 = arith.constant 0 : i32
    return %c0_i32, %c0_i32_0 : i32, i32
  }
  func.func @transform_4(%arg0: i32) -> (i32, i32) {
    %c0_i32 = arith.constant 0 : i32
    %c0_i32_0 = arith.constant 0 : i32
    %c0_i32_1 = arith.constant 0 : i32
    return %c0_i32, %c0_i32_0 : i32, i32
  }
  func.func @transform_5(%arg0: i32) -> (i32, i32) {
    %c0_i32 = arith.constant 0 : i32
    %c0_i32_0 = arith.constant 0 : i32
    %c0_i32_1 = arith.constant 0 : i32
    return %c0_i32, %c0_i32_0 : i32, i32
  }
  func.func @transform_6(%arg0: i32) -> (i32, i32) {
    %c0_i32 = arith.constant 0 : i32
    %c0_i32_0 = arith.constant 0 : i32
    %c0_i32_1 = arith.constant 0 : i32
    return %c0_i32, %c0_i32_0 : i32, i32
  }
  func.func @transform_7(%arg0: i32) -> (i32, i32) {
    %c0_i32 = arith.constant 0 : i32
    %c0_i32_0 = arith.constant 0 : i32
    %c0_i32_1 = arith.constant 0 : i32
    return %c0_i32, %c0_i32_0 : i32, i32
  }
  func.func @transform_8(%arg0: i32) -> (i32, i32) {
    %c0_i32 = arith.constant 0 : i32
    %c0_i32_0 = arith.constant 0 : i32
    %c0_i32_1 = arith.constant 0 : i32
    return %c0_i32, %c0_i32_0 : i32, i32
  }
  func.func @transform_9(%arg0: i32) -> (i32, i32) {
    %c0_i32 = arith.constant 0 : i32
    %c0_i32_0 = arith.constant 0 : i32
    %c0_i32_1 = arith.constant 0 : i32
    return %c0_i32, %c0_i32_0 : i32, i32
  }
  func.func @transform_10(%arg0: i32) -> (i32, i32) {
    %c0_i32 = arith.constant 0 : i32
    %c0_i32_0 = arith.constant 0 : i32
    %c0_i32_1 = arith.constant 0 : i32
    return %c0_i32, %c0_i32_0 : i32, i32
  }
}

</mosaic_0001>

<bundles_post_ra>
// kernel: tpu_custom_call.1
= control target key start
LH: loop header
LB: loop body
LE: loop exit
PB: predicated region body
PF: predicated region fallthrough
CT: control target
= control target key end

     0   :  { %15 = vsyncpa [#allocation3], 0  ;;  %s2769_s0 = inlined_call_operand.hbm [shape: bf16[128,128], index: 0, kind: input, shape index: {}]   ;;  %s2770_s1 = inlined_call_operand.hbm [shape: bf16[128,128], index: 1, kind: input, shape index: {}]   ;;  %s2771_s2 = inlined_call_operand.hbm [shape: bf16[128,128], index: 2, kind: input, shape index: {}]   ;;  %s2772_s3 = inlined_call_operand.vmem [shape: f32[1,128], index: 3, kind: input, shape index: {}]   ;;  %s2773_s4 = inlined_call_operand.hbm [shape: bf16[128,128], index: 4, kind: input, shape index: {}]   ;;  %s2774_s5 = inlined_call_operand.vmem [shape: f32[1,128], index: 5, kind: input, shape index: {}]   ;;  %s2775_s6 = inlined_call_operand.hbm [shape: bf16[128,128], index: 6, kind: input, shape index: {}]   ;;  %s2776_s7 = inlined_call_operand.vmem [shape: f32[1,128], index: 7, kind: input, shape index: {}]   ;;  %s2777_s8 = inlined_call_operand.hbm [shape: bf16[128,128], index: 8, kind: input, shape index: {}]   ;;  %s2778_s9 = inlined_call_operand.vmem [shape: f32[1,128], index: 9, kind: input, shape index: {}]   ;;  %s2779_s10 = inlined_call_operand.hbm [shape: f32[128,128], index: 10, kind: output, shape index: {}]  }
   0x1   :  { %16 = vsyncpa [#allocation6], 0 }
   0x2   :  { %17 = vsyncpa [#allocation9], 0 }
   0x3   :  { %18 = vsyncpa [#allocation12], 0 }
   0x4   :  { %19 = vsyncpa [#allocation4], 0  ;;  %s2365_s13 = smov [#allocation5]   ;;  %s2366_s15 = smov [#allocation8]  }
   0x5   :  { %s37_s14 = sshll.u32 %s2365_s13, 4  ;;  %s63_s16 = sshll.u32 %s2366_s15, 4  ;;  %s38_s14 = int_to_ptr.vmem [resolvable:$true] %s37_s14  ;;  %s2431_s16 = int_to_ptr.vmem [resolvable:$true] %s63_s16 }
   0x6   :  { %s2201_s19 = scalar_lea.hbm %s2770_s1, 1024 }
   0x7   :  { %p2202_p0 = scmp.ne.s32.totalorder %s2770_s1, %s2201_s19  ;;  %p2205_p1 = scmp.lt.u32.totalorder %s2201_s19, %s2770_s1 }
   0x9   :  { %p2207_p2 = pnand %p2205_p1, %p2202_p0 }
   0xb   :  { %2210 = shalt.err (!%p2207_p2)
}
   0xc   :  { %s2211_s24 = scalar_lea.vmem %s38_s14, 1024  ;;  %p2216_p4 = scmp.lt.s32.totalorder %s38_s14, %s38_s14 }
   0xd   :  { %p2212_p3 = scmp.ne.s32.totalorder %s38_s14, %s2211_s24  ;;  %p2217_p5 = scmp.lt.s32.totalorder %s2211_s24, %s2211_s24 }
   0xf   :  { %p2218_p6 = por %p2217_p5, %p2216_p4 }
  0x11   :  { %p2219_p7 = pnand %p2218_p6, %p2212_p3 }
  0x13   :  { %2222 = shalt.err (!%p2219_p7)
}
  0x14   :  { %s2367_s25 = smov 64   ;;  %s2368_s26 = smov 4  }
  0x15   :  { %43 = dma.hbm_to_vmem [thread:$0]  %s2770_s1, 1024, %s38_s14, [#allocation6], %s2367_s25, %s2367_s25, %s2368_s26  }
  0x16   :  { %s2223_s11 = scalar_lea.hbm %s2773_s4, 1024 }
  0x17   :  { %p2224_p8 = scmp.ne.s32.totalorder %s2773_s4, %s2223_s11  ;;  %p2227_p9 = scmp.lt.u32.totalorder %s2223_s11, %s2773_s4 }
  0x19   :  { %p2229_p10 = pnand %p2227_p9, %p2224_p8 }
  0x1b   :  { %2232 = shalt.err (!%p2229_p10)
}
  0x1c   :  { %s2233_s18 = scalar_lea.vmem %s2431_s16, 1024  ;;  %p2238_p12 = scmp.lt.s32.totalorder %s2431_s16, %s2431_s16 }
  0x1d   :  { %p2234_p11 = scmp.ne.s32.totalorder %s2431_s16, %s2233_s18  ;;  %p2239_p13 = scmp.lt.s32.totalorder %s2233_s18, %s2233_s18 }
  0x1f   :  { %p2240_p0 = por %p2239_p13, %p2238_p12 }
  0x21   :  { %p2241_p1 = pnand %p2240_p0, %p2234_p11 }
  0x23   :  { %2244 = shalt.err (!%p2241_p1)
}
  0x24   :  { %69 = dma.hbm_to_vmem [thread:$0]  %s2773_s4, 1024, %s2431_s16, [#allocation9], %s2367_s25, %s2367_s25, %s2368_s26  }
  0x25   :  { %s2369_s19 = smov [#allocation2]   ;;  %s2370_s21 = smov [#allocation7]  }
  0x26   :  { %s25_s20 = sshll.u32 %s2369_s19, 4  ;;  %s49_s22 = sshll.u32 %s2370_s21, 4  ;;  %s26_s20 = int_to_ptr.vmem [resolvable:$true] %s25_s20  ;;  %s2468_s22 = int_to_ptr.vmem [resolvable:$true] %s49_s22 }
  0x27   :  { %s2245_s27 = scalar_lea.hbm %s2769_s0, 1024 }
  0x28   :  { %p2246_p2 = scmp.ne.s32.totalorder %s2769_s0, %s2245_s27  ;;  %p2249_p3 = scmp.lt.u32.totalorder %s2245_s27, %s2769_s0 }
  0x2a   :  { %p2251_p4 = pnand %p2249_p3, %p2246_p2 }
  0x2c   :  { %2254 = shalt.err (!%p2251_p4)
}
  0x2d   :  { %s2255_s4 = scalar_lea.vmem %s26_s20, 1024  ;;  %p2260_p6 = scmp.lt.s32.totalorder %s26_s20, %s26_s20 }
  0x2e   :  { %p2256_p5 = scmp.ne.s32.totalorder %s26_s20, %s2255_s4  ;;  %p2261_p7 = scmp.lt.s32.totalorder %s2255_s4, %s2255_s4 }
  0x30   :  { %p2262_p8 = por %p2261_p7, %p2260_p6 }
  0x32   :  { %p2263_p9 = pnand %p2262_p8, %p2256_p5 }
  0x34   :  { %2266 = shalt.err (!%p2263_p9)
}
  0x35   :  { %31 = dma.hbm_to_vmem [thread:$0]  %s2769_s0, 1024, %s26_s20, [#allocation3], %s2367_s25, %s2367_s25, %s2368_s26  }
  0x36   :  { %s2267_s17 = scalar_lea.hbm %s2771_s2, 1024 }
  0x37   :  { %p2268_p10 = scmp.ne.s32.totalorder %s2771_s2, %s2267_s17  ;;  %p2271_p11 = scmp.lt.u32.totalorder %s2267_s17, %s2771_s2 }
  0x39   :  { %p2273_p12 = pnand %p2271_p11, %p2268_p10 }
  0x3b   :  { %2276 = shalt.err (!%p2273_p12)
}
  0x3c   :  { %s2277_s21 = scalar_lea.vmem %s2468_s22, 1024  ;;  %p2282_p0 = scmp.lt.s32.totalorder %s2468_s22, %s2468_s22 }
  0x3d   :  { %p2278_p13 = scmp.ne.s32.totalorder %s2468_s22, %s2277_s21  ;;  %p2283_p1 = scmp.lt.s32.totalorder %s2277_s21, %s2277_s21 }
  0x3f   :  { %p2284_p2 = por %p2283_p1, %p2282_p0 }
  0x41   :  { %p2285_p3 = pnand %p2284_p2, %p2278_p13 }
  0x43   :  { %2288 = shalt.err (!%p2285_p3)
}
  0x44   :  { %55 = dma.hbm_to_vmem [thread:$0]  %s2771_s2, 1024, %s2468_s22, [#allocation6], %s2367_s25, %s2367_s25, %s2368_s26  }
  0x45   :  { %s2371_s23 = smov [#allocation10]   ;;  %s2372_s27 = smov [#allocation11]  }
  0x46   :  { %s77_s24 = sshll.u32 %s2371_s23, 4  ;;  %s91_s28 = sshll.u32 %s2372_s27, 4  ;;  %s78_s24 = int_to_ptr.vmem [resolvable:$true] %s77_s24  ;;  %s2505_s28 = int_to_ptr.vmem [resolvable:$true] %s91_s28 }
  0x47   :  { %s2289_s11 = scalar_lea.hbm %s2775_s6, 1024 }
  0x48   :  { %p2290_p4 = scmp.ne.s32.totalorder %s2775_s6, %s2289_s11  ;;  %p2293_p5 = scmp.lt.u32.totalorder %s2289_s11, %s2775_s6 }
  0x4a   :  { %p2295_p6 = pnand %p2293_p5, %p2290_p4 }
  0x4c   :  { %2298 = shalt.err (!%p2295_p6)
}
  0x4d   :  { %s2299_s2 = scalar_lea.vmem %s78_s24, 1024  ;;  %p2304_p8 = scmp.lt.s32.totalorder %s78_s24, %s78_s24 }
  0x4e   :  { %p2300_p7 = scmp.ne.s32.totalorder %s78_s24, %s2299_s2  ;;  %p2305_p9 = scmp.lt.s32.totalorder %s2299_s2, %s2299_s2 }
  0x50   :  { %p2306_p10 = por %p2305_p9, %p2304_p8 }
  0x52   :  { %p2307_p11 = pnand %p2306_p10, %p2300_p7 }
  0x54   :  { %2310 = shalt.err (!%p2307_p11)
}
  0x55   :  { %83 = dma.hbm_to_vmem [thread:$0]  %s2775_s6, 1024, %s78_s24, [#allocation9], %s2367_s25, %s2367_s25, %s2368_s26  }
  0x56   :  { %s2311_s1 = scalar_lea.hbm %s2777_s8, 1024 }
  0x57   :  { %p2312_p12 = scmp.ne.s32.totalorder %s2777_s8, %s2311_s1  ;;  %p2315_p13 = scmp.lt.u32.totalorder %s2311_s1, %s2777_s8 }
  0x59   :  { %p2317_p0 = pnand %p2315_p13, %p2312_p12 }
  0x5b   :  { %2320 = shalt.err (!%p2317_p0)
}
  0x5c   :  { %s2321_s20 = scalar_lea.vmem %s2505_s28, 1024  ;;  %p2326_p2 = scmp.lt.s32.totalorder %s2505_s28, %s2505_s28 }
  0x5d   :  { %p2322_p1 = scmp.ne.s32.totalorder %s2505_s28, %s2321_s20  ;;  %p2327_p3 = scmp.lt.s32.totalorder %s2321_s20, %s2321_s20 }
  0x5f   :  { %p2328_p4 = por %p2327_p3, %p2326_p2 }
  0x61   :  { %p2329_p5 = pnand %p2328_p4, %p2322_p1 }
  0x63   :  { %2332 = shalt.err (!%p2329_p5)
}
  0x64   :  { %97 = dma.hbm_to_vmem [thread:$0]  %s2777_s8, 1024, %s2505_s28, [#allocation12], %s2367_s25, %s2367_s25, %s2368_s26  }
  0x65   :  { %2355 = dma.done.wait [#allocation3], 1024  }
  0x66   :  { %2356 = vsyncadd [#allocation3], 4294966272 }
  0x67   :  { %2357 = dma.done.wait [#allocation6], 2048  }
  0x68   :  { %2358 = vsyncadd [#allocation6], 4294965248 }
  0x69   :  { %2359 = dma.done.wait [#allocation9], 2048  }
  0x6a   :  { %2360 = vsyncadd [#allocation9], 4294965248 }
  0x6b   :  { %2361 = dma.done.wait [#allocation12], 1024  }
  0x6c   :  { %2362 = vsyncadd [#allocation12], 4294966272  ;;  %v2089_v0 = vld [vmem:[#allocation7] sm:$0xff]   ;;  %v2090_v1 = vld [vmem:[#allocation7 + $0x8] sm:$0xff]  }
  0x6d   :  { %1822 = vmatprep.subr.bf16.mxu0 %v2089_v0  ;;  %v2091_v2 = vld [vmem:[#allocation7 + $0x10] sm:$0xff]   ;;  %v2092_v3 = vld [vmem:[#allocation7 + $0x18] sm:$0xff]   ;;  %v2097_v4 = vld [vmem:[#allocation5] sm:$0xff]  }
  0x6e   :  { %1823 = vmatpush3.bf16.msra.mxu0 %v2089_v0  ;;  %1838 = vmatprep.mubr.bf16.mxu0 %v2097_v4  ;;  %v2093_v5 = vld [vmem:[#allocation7 + $0x20] sm:$0xff]   ;;  %v2094_v6 = vld [vmem:[#allocation7 + $0x28] sm:$0xff]   ;;  %v2095_v7 = vld [vmem:[#allocation7 + $0x30] sm:$0xff]  }
  0x6f   :  { %1824 = vmatprep.subr.bf16.mxu0 %v2090_v1  ;;  %v2096_v8 = vld [vmem:[#allocation7 + $0x38] sm:$0xff]   ;;  %v2098_v9 = vld [vmem:[#allocation5 + $0x8] sm:$0xff]   ;;  %v2099_v10 = vld [vmem:[#allocation5 + $0x10] sm:$0xff]  }
  0x70   :  { %v2100_v11 = vld [vmem:[#allocation5 + $0x18] sm:$0xff]   ;;  %v2101_v12 = vld [vmem:[#allocation5 + $0x20] sm:$0xff]   ;;  %v2102_v13 = vld [vmem:[#allocation5 + $0x28] sm:$0xff]  }
  0x71   :  { %v2103_v14 = vld [vmem:[#allocation5 + $0x30] sm:$0xff]   ;;  %v2104_v15 = vld [vmem:[#allocation5 + $0x38] sm:$0xff]   ;;  %v2542_v16 = vld [vmem:[#allocation2] sm:$0xff]  }
  0x72   :  { %1825 = vmatpush3.bf16.msra.mxu0 %v2090_v1  ;;  %1870 = vmatprep.mubr.bf16.mxu1 %v2542_v16  ;;  %v2113_v17 = vld [vmem:[#allocation8] sm:$0xff]   ;;  %v2114_v18 = vld [vmem:[#allocation8 + $0x8] sm:$0xff]   ;;  %v2115_v19 = vld [vmem:[#allocation8 + $0x10] sm:$0xff]  }
  0x73   :  { %1826 = vmatprep.subr.bf16.mxu0 %v2091_v2  ;;  %v2116_v20 = vld [vmem:[#allocation8 + $0x18] sm:$0xff]   ;;  %v2117_v21 = vld [vmem:[#allocation8 + $0x20] sm:$0xff]   ;;  %v2118_v22 = vld [vmem:[#allocation8 + $0x28] sm:$0xff]  }
  0x74   :  { %v2545_v47 = vld [vmem:[#allocation2 + $0x8] sm:$0xff]   ;;  %v2547_v48 = vld [vmem:[#allocation2 + $0x10] sm:$0xff]   ;;  %v2551_v49 = vld [vmem:[#allocation2 + $0x18] sm:$0xff]  }
  0x75   :  { %v2553_v50 = vld [vmem:[#allocation2 + $0x20] sm:$0xff]   ;;  %v2557_v51 = vld [vmem:[#allocation2 + $0x28] sm:$0xff]   ;;  %v2559_v52 = vld [vmem:[#allocation2 + $0x30] sm:$0xff]  }
  0x76   :  { %1827 = vmatpush3.bf16.msra.mxu0 %v2091_v2  ;;  %v2563_v53 = vld [vmem:[#allocation2 + $0x38] sm:$0xff]   ;;  %v2119_v54 = vld [vmem:[#allocation8 + $0x30] sm:$0xff]   ;;  %v1658_v56 = vld [vmem:[%s2772_s3] ss:$0 sm:$0xff] }
  0x77   :  { %1828 = vmatprep.subr.bf16.mxu0 %v2092_v3  ;;  %v2120_v55 = vld [vmem:[#allocation8 + $0x38] sm:$0xff]  }
  0x7a   :  { %1829 = vmatpush3.bf16.msra.mxu0 %v2092_v3 }
  0x7b   :  { %1830 = vmatprep.subr.bf16.mxu0 %v2093_v5 }
  0x7e   :  { %1831 = vmatpush3.bf16.msra.mxu0 %v2093_v5 }
  0x7f   :  { %1832 = vmatprep.subr.bf16.mxu0 %v2094_v6 }
  0x82   :  { %1833 = vmatpush3.bf16.msra.mxu0 %v2094_v6 }
  0x83   :  { %1834 = vmatprep.subr.bf16.mxu0 %v2095_v7 }
  0x86   :  { %1835 = vmatpush3.bf16.msra.mxu0 %v2095_v7 }
  0x87   :  { %1836 = vmatprep.subr.bf16.mxu0 %v2096_v8 }
  0x8a   :  { %1837 = vmatpush3.bf16.msra.mxu0 %v2096_v8 }
  0x8b   :  { %1886 = vmatprep.subr.bf16.mxu0 %v2113_v17 }
  0x8d   :  { %1839 = vmatmul.mubr.bf16.vlgmr.msra.gmra.mrb[0].mxu0 %v2098_v9 }
  0x8e   :  { %1842 = vmatprep.mubr.bf16.mxu0 %v2099_v10  ;;  %1887 = vmatpush3.bf16.msra.mxu0 %v2113_v17 }
  0x8f   :  { %1888 = vmatprep.subr.bf16.mxu0 %v2114_v18 }
  0x92   :  { %1889 = vmatpush3.bf16.msra.mxu0 %v2114_v18 }
  0x93   :  { %1890 = vmatprep.subr.bf16.mxu0 %v2115_v19 }
  0x95   :  { %1843 = vmatmul.mubr.bf16.gmra.mrb[4].mxu0 %v2100_v11 }
  0x96   :  { %1846 = vmatprep.mubr.bf16.mxu0 %v2101_v12  ;;  %1891 = vmatpush3.bf16.msra.mxu0 %v2115_v19 }
  0x97   :  { %1892 = vmatprep.subr.bf16.mxu0 %v2116_v20 }
  0x9a   :  { %1893 = vmatpush3.bf16.msra.mxu0 %v2116_v20 }
  0x9b   :  { %1894 = vmatprep.subr.bf16.mxu0 %v2117_v21 }
  0x9d   :  { %1847 = vmatmul.mubr.bf16.gmra.mrb[8].mxu0 %v2102_v13 }
  0x9e   :  { %1850 = vmatprep.mubr.bf16.mxu0 %v2103_v14  ;;  %1895 = vmatpush3.bf16.msra.mxu0 %v2117_v21 }
  0x9f   :  { %1896 = vmatprep.subr.bf16.mxu0 %v2118_v22 }
  0xa2   :  { %1897 = vmatpush3.bf16.msra.mxu0 %v2118_v22 }
  0xa3   :  { %1898 = vmatprep.subr.bf16.mxu0 %v2119_v54 }
  0xa5   :  { %1851 = vmatmul.mubr.bf16.gmra.mrb[12].mxu0 %v2104_v15 }
  0xa6   :  { %1899 = vmatpush3.bf16.msra.mxu0 %v2119_v54 }
  0xa7   :  { %1900 = vmatprep.subr.bf16.mxu0 %v2120_v55 }
  0xaa   :  { %1901 = vmatpush3.bf16.msra.mxu0 %v2120_v55 }
 0x160   :  { %v1840_v23 = vpop.f32.mrb[0].mxu0 }
 0x161   :  { %v297_v24 = vpop.f32.mrb[1].mxu0 }
 0x162   :  { %v1841_v25 = vpop.f32.mrb[2].mxu0 }
 0x163   :  { %v361_v26 = vpack.c.bf16 %v1841_v25, %v1840_v23  ;;  %v300_v27 = vpop.f32.mrb[3].mxu0 }
 0x164   :  { %v360_v28 = vpack.c.bf16 %v300_v27, %v297_v24 }
 0x166   :  { %1854 = vmatprep.subr.bf16.mxu1 %v360_v28 }
 0x167   :  { %1855 = vmatpush3.bf16.msra.mxu1 %v360_v28 }
 0x168   :  { %v1844_v29 = vpop.f32.mrb[4].mxu0  ;;  %1856 = vmatprep.subr.bf16.mxu1 %v361_v26 }
 0x169   :  { %v313_v30 = vpop.f32.mrb[5].mxu0 }
 0x16a   :  { %v1845_v31 = vpop.f32.mrb[6].mxu0 }
 0x16b   :  { %v363_v32 = vpack.c.bf16 %v1845_v31, %v1844_v29  ;;  %v316_v33 = vpop.f32.mrb[7].mxu0  ;;  %1857 = vmatpush3.bf16.msra.mxu1 %v361_v26 }
 0x16c   :  { %v362_v34 = vpack.c.bf16 %v316_v33, %v313_v30 }
 0x16e   :  { %1858 = vmatprep.subr.bf16.mxu1 %v362_v34 }
 0x16f   :  { %1859 = vmatpush3.bf16.msra.mxu1 %v362_v34 }
 0x170   :  { %v1848_v35 = vpop.f32.mrb[8].mxu0  ;;  %1860 = vmatprep.subr.bf16.mxu1 %v363_v32 }
 0x171   :  { %v329_v36 = vpop.f32.mrb[9].mxu0 }
 0x172   :  { %v1849_v37 = vpop.f32.mrb[10].mxu0 }
 0x173   :  { %v365_v38 = vpack.c.bf16 %v1849_v37, %v1848_v35  ;;  %v332_v39 = vpop.f32.mrb[11].mxu0  ;;  %1861 = vmatpush3.bf16.msra.mxu1 %v363_v32 }
 0x174   :  { %v364_v40 = vpack.c.bf16 %v332_v39, %v329_v36 }
 0x176   :  { %1862 = vmatprep.subr.bf16.mxu1 %v364_v40 }
 0x177   :  { %1863 = vmatpush3.bf16.msra.mxu1 %v364_v40 }
 0x178   :  { %v1852_v41 = vpop.f32.mrb[12].mxu0  ;;  %1864 = vmatprep.subr.bf16.mxu1 %v365_v38 }
 0x179   :  { %v345_v42 = vpop.f32.mrb[13].mxu0 }
 0x17a   :  { %v1853_v43 = vpop.f32.mrb[14].mxu0 }
 0x17b   :  { %v367_v44 = vpack.c.bf16 %v1853_v43, %v1852_v41  ;;  %v348_v45 = vpop.f32.mrb[15].mxu0  ;;  %1865 = vmatpush3.bf16.msra.mxu1 %v365_v38 }
 0x17c   :  { %v366_v46 = vpack.c.bf16 %v348_v45, %v345_v42 }
 0x17e   :  { %1866 = vmatprep.subr.bf16.mxu1 %v366_v46 }
 0x17f   :  { %1867 = vmatpush3.bf16.msra.mxu1 %v366_v46 }
 0x180   :  { %1868 = vmatprep.subr.bf16.mxu1 %v367_v44 }
 0x183   :  { %1869 = vmatpush3.bf16.msra.mxu1 %v367_v44 }
 0x186   :  { %1871 = vmatmul.mubr.bf16.vlgmr.msra.gmra.mrb[0].mxu1 %v2545_v47 }
 0x187   :  { %1874 = vmatprep.mubr.bf16.mxu1 %v2547_v48 }
 0x18e   :  { %1875 = vmatmul.mubr.bf16.gmra.mrb[4].mxu1 %v2551_v49 }
 0x18f   :  { %1878 = vmatprep.mubr.bf16.mxu1 %v2553_v50 }
 0x196   :  { %1879 = vmatmul.mubr.bf16.gmra.mrb[8].mxu1 %v2557_v51 }
 0x197   :  { %1882 = vmatprep.mubr.bf16.mxu1 %v2559_v52 }
 0x19e   :  { %1883 = vmatmul.mubr.bf16.gmra.mrb[12].mxu1 %v2563_v53 }
 0x19f   :  { %1934 = vmatprep.mubr.bf16.mxu1 %v2542_v16 }
 0x259   :  { %v1872_v57 = vpop.f32.mrb[0].mxu1 }
 0x25a   :  { %v466_v58 = vadd.f32 %v1872_v57, %v1658_v56  ;;  %v457_v59 = vpop.f32.mrb[1].mxu1 }
 0x25b   :  { %v458_v60 = vadd.f32 %v1658_v56, %v457_v59  ;;  %v1873_v61 = vpop.f32.mrb[2].mxu1  ;;  %v2122_v59 = vld [vmem:[#allocation10 + $0x8] sm:$0xff]  }
 0x25c   :  { %v469_v62 = vadd.f32 %v1873_v61, %v1658_v56  ;;  %v460_v63 = vpop.f32.mrb[3].mxu1  ;;  %v522_v1 = vmax.f32 %v466_v58, 0.0  ;;  %v2121_v58 = vld [vmem:[#allocation10] sm:$0xff]   ;;  %v2124_v61 = vld [vmem:[#allocation10 + $0x18] sm:$0xff]  }
 0x25d   :  { %v461_v0 = vadd.f32 %v1658_v56, %v460_v63  ;;  %v520_v3 = vmax.f32 %v458_v60, 0.0  ;;  %1950 = vmatprep.subr.bf16.mxu0 %v2121_v58  ;;  %v2123_v60 = vld [vmem:[#allocation10 + $0x10] sm:$0xff]  }
 0x25e   :  { %v523_v2 = vmax.f32 %v469_v62, 0.0  ;;  %v2126_v62 = vld [vmem:[#allocation10 + $0x28] sm:$0xff]  }
 0x25f   :  { %v521_v4 = vmax.f32 %v461_v0, 0.0 }
 0x260   :  { %v537_v5 = vpack.c.bf16 %v523_v2, %v522_v1 }
 0x261   :  { %v536_v6 = vpack.c.bf16 %v521_v4, %v520_v3  ;;  %v1876_v7 = vpop.f32.mrb[4].mxu1 }
 0x262   :  { %v482_v8 = vadd.f32 %v1876_v7, %v1658_v56  ;;  %v473_v9 = vpop.f32.mrb[5].mxu1 }
 0x263   :  { %v474_v10 = vadd.f32 %v1658_v56, %v473_v9  ;;  %v1877_v11 = vpop.f32.mrb[6].mxu1  ;;  %1902 = vmatprep.mubr.bf16.mxu0 %v536_v6 }
 0x264   :  { %v485_v12 = vadd.f32 %v1877_v11, %v1658_v56  ;;  %v476_v13 = vpop.f32.mrb[7].mxu1  ;;  %1903 = vmatmul.mubr.bf16.vlgmr.msra.gmra.mrb[16].mxu0 %v537_v5  ;;  %v526_v15 = vmax.f32 %v482_v8, 0.0 }
 0x265   :  { %v477_v14 = vadd.f32 %v1658_v56, %v476_v13  ;;  %v524_v18 = vmax.f32 %v474_v10, 0.0  ;;  %1951 = vmatpush3.bf16.msra.mxu0 %v2121_v58 }
 0x266   :  { %v527_v17 = vmax.f32 %v485_v12, 0.0  ;;  %1952 = vmatprep.subr.bf16.mxu0 %v2122_v59 }
 0x267   :  { %v525_v19 = vmax.f32 %v477_v14, 0.0 }
 0x268   :  { %v539_v20 = vpack.c.bf16 %v527_v17, %v526_v15 }
 0x269   :  { %v538_v21 = vpack.c.bf16 %v525_v19, %v524_v18  ;;  %v1880_v22 = vpop.f32.mrb[8].mxu1  ;;  %1953 = vmatpush3.bf16.msra.mxu0 %v2122_v59 }
 0x26a   :  { %v498_v23 = vadd.f32 %v1880_v22, %v1658_v56  ;;  %v489_v24 = vpop.f32.mrb[9].mxu1  ;;  %1954 = vmatprep.subr.bf16.mxu0 %v2123_v60 }
 0x26b   :  { %v490_v25 = vadd.f32 %v1658_v56, %v489_v24  ;;  %v1881_v26 = vpop.f32.mrb[10].mxu1  ;;  %1906 = vmatprep.mubr.bf16.mxu0 %v538_v21  ;;  %v2127_v24 = vld [vmem:[#allocation10 + $0x30] sm:$0xff]  }
 0x26c   :  { %v501_v27 = vadd.f32 %v1881_v26, %v1658_v56  ;;  %v492_v28 = vpop.f32.mrb[11].mxu1  ;;  %1907 = vmatmul.mubr.bf16.gmra.mrb[20].mxu0 %v539_v20  ;;  %v530_v30 = vmax.f32 %v498_v23, 0.0  ;;  %v1675_v26 = vld [vmem:[%s2774_s5] ss:$0 sm:$0xff] }
 0x26d   :  { %v493_v29 = vadd.f32 %v1658_v56, %v492_v28  ;;  %v528_v32 = vmax.f32 %v490_v25, 0.0  ;;  %1955 = vmatpush3.bf16.msra.mxu0 %v2123_v60  ;;  %v2128_v25 = vld [vmem:[#allocation10 + $0x38] sm:$0xff]  }
 0x26e   :  { %v531_v31 = vmax.f32 %v501_v27, 0.0  ;;  %1956 = vmatprep.subr.bf16.mxu0 %v2124_v61 }
 0x26f   :  { %v529_v33 = vmax.f32 %v493_v29, 0.0 }
 0x270   :  { %v541_v34 = vpack.c.bf16 %v531_v31, %v530_v30 }
 0x271   :  { %v540_v35 = vpack.c.bf16 %v529_v33, %v528_v32  ;;  %v1884_v36 = vpop.f32.mrb[12].mxu1  ;;  %1957 = vmatpush3.bf16.msra.mxu0 %v2124_v61 }
 0x272   :  { %v514_v37 = vadd.f32 %v1884_v36, %v1658_v56  ;;  %v505_v38 = vpop.f32.mrb[13].mxu1 }
 0x273   :  { %v506_v39 = vadd.f32 %v1658_v56, %v505_v38  ;;  %v1885_v40 = vpop.f32.mrb[14].mxu1  ;;  %1910 = vmatprep.mubr.bf16.mxu0 %v540_v35 }
 0x274   :  { %v517_v41 = vadd.f32 %v1885_v40, %v1658_v56  ;;  %v508_v42 = vpop.f32.mrb[15].mxu1  ;;  %1911 = vmatmul.mubr.bf16.gmra.mrb[24].mxu0 %v541_v34  ;;  %v534_v44 = vmax.f32 %v514_v37, 0.0 }
 0x275   :  { %v509_v43 = vadd.f32 %v1658_v56, %v508_v42  ;;  %v532_v46 = vmax.f32 %v506_v39, 0.0  ;;  %v2125_v56 = vld [vmem:[#allocation10 + $0x20] sm:$0xff]  }
 0x276   :  { %v535_v45 = vmax.f32 %v517_v41, 0.0  ;;  %1958 = vmatprep.subr.bf16.mxu0 %v2125_v56 }
 0x277   :  { %v533_v54 = vmax.f32 %v509_v43, 0.0  ;;  %1959 = vmatpush3.bf16.msra.mxu0 %v2125_v56 }
 0x278   :  { %v543_v55 = vpack.c.bf16 %v535_v45, %v534_v44  ;;  %1960 = vmatprep.subr.bf16.mxu0 %v2126_v62 }
 0x279   :  { %v542_v57 = vpack.c.bf16 %v533_v54, %v532_v46 }
 0x27b   :  { %1914 = vmatprep.mubr.bf16.mxu0 %v542_v57  ;;  %1961 = vmatpush3.bf16.msra.mxu0 %v2126_v62 }
 0x27c   :  { %1915 = vmatmul.mubr.bf16.gmra.mrb[28].mxu0 %v543_v55  ;;  %1962 = vmatprep.subr.bf16.mxu0 %v2127_v24 }
 0x27f   :  { %1963 = vmatpush3.bf16.msra.mxu0 %v2127_v24 }
 0x280   :  { %1964 = vmatprep.subr.bf16.mxu0 %v2128_v25 }
 0x283   :  { %1965 = vmatpush3.bf16.msra.mxu0 %v2128_v25 }
 0x337   :  { %v1904_v63 = vpop.f32.mrb[16].mxu0 }
 0x338   :  { %v642_v0 = vpop.f32.mrb[17].mxu0 }
 0x339   :  { %v1905_v1 = vpop.f32.mrb[18].mxu0 }
 0x33a   :  { %v706_v2 = vpack.c.bf16 %v1905_v1, %v1904_v63  ;;  %v645_v3 = vpop.f32.mrb[19].mxu0 }
 0x33b   :  { %v705_v4 = vpack.c.bf16 %v645_v3, %v642_v0 }
 0x33d   :  { %1918 = vmatprep.subr.bf16.mxu1 %v705_v4 }
 0x33e   :  { %1919 = vmatpush3.bf16.msra.mxu1 %v705_v4 }
 0x33f   :  { %v1908_v5 = vpop.f32.mrb[20].mxu0  ;;  %1920 = vmatprep.subr.bf16.mxu1 %v706_v2 }
 0x340   :  { %v658_v6 = vpop.f32.mrb[21].mxu0 }
 0x341   :  { %v1909_v7 = vpop.f32.mrb[22].mxu0 }
 0x342   :  { %v708_v8 = vpack.c.bf16 %v1909_v7, %v1908_v5  ;;  %v661_v9 = vpop.f32.mrb[23].mxu0  ;;  %1921 = vmatpush3.bf16.msra.mxu1 %v706_v2 }
 0x343   :  { %v707_v10 = vpack.c.bf16 %v661_v9, %v658_v6 }
 0x345   :  { %1922 = vmatprep.subr.bf16.mxu1 %v707_v10 }
 0x346   :  { %1923 = vmatpush3.bf16.msra.mxu1 %v707_v10 }
 0x347   :  { %v1912_v11 = vpop.f32.mrb[24].mxu0  ;;  %1924 = vmatprep.subr.bf16.mxu1 %v708_v8 }
 0x348   :  { %v674_v12 = vpop.f32.mrb[25].mxu0 }
 0x349   :  { %v1913_v13 = vpop.f32.mrb[26].mxu0 }
 0x34a   :  { %v710_v14 = vpack.c.bf16 %v1913_v13, %v1912_v11  ;;  %v677_v15 = vpop.f32.mrb[27].mxu0  ;;  %1925 = vmatpush3.bf16.msra.mxu1 %v708_v8 }
 0x34b   :  { %v709_v17 = vpack.c.bf16 %v677_v15, %v674_v12 }
 0x34d   :  { %1926 = vmatprep.subr.bf16.mxu1 %v709_v17 }
 0x34e   :  { %1927 = vmatpush3.bf16.msra.mxu1 %v709_v17 }
 0x34f   :  { %v1916_v18 = vpop.f32.mrb[28].mxu0  ;;  %1928 = vmatprep.subr.bf16.mxu1 %v710_v14 }
 0x350   :  { %v690_v19 = vpop.f32.mrb[29].mxu0 }
 0x351   :  { %v1917_v20 = vpop.f32.mrb[30].mxu0 }
 0x352   :  { %v712_v21 = vpack.c.bf16 %v1917_v20, %v1916_v18  ;;  %v693_v22 = vpop.f32.mrb[31].mxu0  ;;  %1929 = vmatpush3.bf16.msra.mxu1 %v710_v14 }
 0x353   :  { %v711_v23 = vpack.c.bf16 %v693_v22, %v690_v19 }
 0x355   :  { %1930 = vmatprep.subr.bf16.mxu1 %v711_v23 }
 0x356   :  { %1931 = vmatpush3.bf16.msra.mxu1 %v711_v23 }
 0x357   :  { %1932 = vmatprep.subr.bf16.mxu1 %v712_v21 }
 0x35a   :  { %1933 = vmatpush3.bf16.msra.mxu1 %v712_v21 }
 0x35d   :  { %1935 = vmatmul.mubr.bf16.vlgmr.msra.gmra.mrb[16].mxu1 %v2545_v47 }
 0x35e   :  { %1938 = vmatprep.mubr.bf16.mxu1 %v2547_v48 }
 0x365   :  { %1939 = vmatmul.mubr.bf16.gmra.mrb[20].mxu1 %v2551_v49 }
 0x366   :  { %1942 = vmatprep.mubr.bf16.mxu1 %v2553_v50 }
 0x36d   :  { %1943 = vmatmul.mubr.bf16.gmra.mrb[24].mxu1 %v2557_v51 }
 0x36e   :  { %1946 = vmatprep.mubr.bf16.mxu1 %v2559_v52 }
 0x375   :  { %1947 = vmatmul.mubr.bf16.gmra.mrb[28].mxu1 %v2563_v53 }
 0x376   :  { %1998 = vmatprep.mubr.bf16.mxu1 %v2542_v16 }
 0x430   :  { %v1936_v27 = vpop.f32.mrb[16].mxu1 }
 0x431   :  { %v763_v28 = vadd.f32 %v1936_v27, %v1675_v26  ;;  %v754_v29 = vpop.f32.mrb[17].mxu1 }
 0x432   :  { %v755_v30 = vadd.f32 %v1675_v26, %v754_v29  ;;  %v1937_v31 = vpop.f32.mrb[18].mxu1  ;;  %v2130_v29 = vld [vmem:[#allocation11 + $0x8] sm:$0xff]  }
 0x433   :  { %v766_v32 = vadd.f32 %v1937_v31, %v1675_v26  ;;  %v757_v33 = vpop.f32.mrb[19].mxu1  ;;  %v819_v35 = vmax.f32 %v763_v28, 0.0  ;;  %v2129_v28 = vld [vmem:[#allocation11] sm:$0xff]   ;;  %v2132_v31 = vld [vmem:[#allocation11 + $0x18] sm:$0xff]  }
 0x434   :  { %v758_v34 = vadd.f32 %v1675_v26, %v757_v33  ;;  %v817_v37 = vmax.f32 %v755_v30, 0.0  ;;  %2014 = vmatprep.subr.bf16.mxu0 %v2129_v28  ;;  %v2131_v30 = vld [vmem:[#allocation11 + $0x10] sm:$0xff]  }
 0x435   :  { %v820_v36 = vmax.f32 %v766_v32, 0.0  ;;  %v2134_v32 = vld [vmem:[#allocation11 + $0x28] sm:$0xff]  }
 0x436   :  { %v818_v38 = vmax.f32 %v758_v34, 0.0 }
 0x437   :  { %v834_v39 = vpack.c.bf16 %v820_v36, %v819_v35 }
 0x438   :  { %v833_v40 = vpack.c.bf16 %v818_v38, %v817_v37  ;;  %v1940_v41 = vpop.f32.mrb[20].mxu1 }
 0x439   :  { %v779_v42 = vadd.f32 %v1940_v41, %v1675_v26  ;;  %v770_v43 = vpop.f32.mrb[21].mxu1 }
 0x43a   :  { %v771_v44 = vadd.f32 %v1675_v26, %v770_v43  ;;  %v1941_v45 = vpop.f32.mrb[22].mxu1  ;;  %1966 = vmatprep.mubr.bf16.mxu0 %v833_v40 }
 0x43b   :  { %v782_v46 = vadd.f32 %v1941_v45, %v1675_v26  ;;  %v773_v54 = vpop.f32.mrb[23].mxu1  ;;  %1967 = vmatmul.mubr.bf16.vlgmr.msra.gmra.mrb[32].mxu0 %v834_v39  ;;  %v823_v57 = vmax.f32 %v779_v42, 0.0 }
 0x43c   :  { %v774_v55 = vadd.f32 %v1675_v26, %v773_v54  ;;  %v821_v59 = vmax.f32 %v771_v44, 0.0  ;;  %2015 = vmatpush3.bf16.msra.mxu0 %v2129_v28 }
 0x43d   :  { %v824_v58 = vmax.f32 %v782_v46, 0.0  ;;  %2016 = vmatprep.subr.bf16.mxu0 %v2130_v29 }
 0x43e   :  { %v822_v60 = vmax.f32 %v774_v55, 0.0 }
 0x43f   :  { %v836_v61 = vpack.c.bf16 %v824_v58, %v823_v57 }
 0x440   :  { %v835_v56 = vpack.c.bf16 %v822_v60, %v821_v59  ;;  %v1944_v62 = vpop.f32.mrb[24].mxu1  ;;  %2017 = vmatpush3.bf16.msra.mxu0 %v2130_v29 }
 0x441   :  { %v795_v63 = vadd.f32 %v1944_v62, %v1675_v26  ;;  %v786_v0 = vpop.f32.mrb[25].mxu1  ;;  %2018 = vmatprep.subr.bf16.mxu0 %v2131_v30 }
 0x442   :  { %v787_v1 = vadd.f32 %v1675_v26, %v786_v0  ;;  %v1945_v2 = vpop.f32.mrb[26].mxu1  ;;  %1970 = vmatprep.mubr.bf16.mxu0 %v835_v56  ;;  %v2135_v0 = vld [vmem:[#allocation11 + $0x30] sm:$0xff]  }
 0x443   :  { %v798_v3 = vadd.f32 %v1945_v2, %v1675_v26  ;;  %v789_v4 = vpop.f32.mrb[27].mxu1  ;;  %1971 = vmatmul.mubr.bf16.gmra.mrb[36].mxu0 %v836_v61  ;;  %v827_v6 = vmax.f32 %v795_v63, 0.0  ;;  %v1684_v2 = vld [vmem:[%s2776_s7] ss:$0 sm:$0xff] }
 0x444   :  { %v790_v5 = vadd.f32 %v1675_v26, %v789_v4  ;;  %v825_v8 = vmax.f32 %v787_v1, 0.0  ;;  %2019 = vmatpush3.bf16.msra.mxu0 %v2131_v30  ;;  %v2136_v1 = vld [vmem:[#allocation11 + $0x38] sm:$0xff]  }
 0x445   :  { %v828_v7 = vmax.f32 %v798_v3, 0.0  ;;  %2020 = vmatprep.subr.bf16.mxu0 %v2132_v31 }
 0x446   :  { %v826_v9 = vmax.f32 %v790_v5, 0.0 }
 0x447   :  { %v838_v10 = vpack.c.bf16 %v828_v7, %v827_v6 }
 0x448   :  { %v837_v11 = vpack.c.bf16 %v826_v9, %v825_v8  ;;  %v1948_v12 = vpop.f32.mrb[28].mxu1  ;;  %2021 = vmatpush3.bf16.msra.mxu0 %v2132_v31 }
 0x449   :  { %v811_v13 = vadd.f32 %v1948_v12, %v1675_v26  ;;  %v802_v14 = vpop.f32.mrb[29].mxu1 }
 0x44a   :  { %v803_v15 = vadd.f32 %v1675_v26, %v802_v14  ;;  %v1949_v17 = vpop.f32.mrb[30].mxu1  ;;  %1974 = vmatprep.mubr.bf16.mxu0 %v837_v11 }
 0x44b   :  { %v814_v18 = vadd.f32 %v1949_v17, %v1675_v26  ;;  %v805_v19 = vpop.f32.mrb[31].mxu1  ;;  %1975 = vmatmul.mubr.bf16.gmra.mrb[40].mxu0 %v838_v10  ;;  %v831_v21 = vmax.f32 %v811_v13, 0.0 }
 0x44c   :  { %v806_v20 = vadd.f32 %v1675_v26, %v805_v19  ;;  %v829_v23 = vmax.f32 %v803_v15, 0.0  ;;  %v2133_v26 = vld [vmem:[#allocation11 + $0x20] sm:$0xff]  }
 0x44d   :  { %v832_v22 = vmax.f32 %v814_v18, 0.0  ;;  %2022 = vmatprep.subr.bf16.mxu0 %v2133_v26 }
 0x44e   :  { %v830_v24 = vmax.f32 %v806_v20, 0.0  ;;  %2023 = vmatpush3.bf16.msra.mxu0 %v2133_v26 }
 0x44f   :  { %v840_v25 = vpack.c.bf16 %v832_v22, %v831_v21  ;;  %2024 = vmatprep.subr.bf16.mxu0 %v2134_v32 }
 0x450   :  { %v839_v27 = vpack.c.bf16 %v830_v24, %v829_v23 }
 0x452   :  { %1978 = vmatprep.mubr.bf16.mxu0 %v839_v27  ;;  %2025 = vmatpush3.bf16.msra.mxu0 %v2134_v32 }
 0x453   :  { %1979 = vmatmul.mubr.bf16.gmra.mrb[44].mxu0 %v840_v25  ;;  %2026 = vmatprep.subr.bf16.mxu0 %v2135_v0 }
 0x456   :  { %2027 = vmatpush3.bf16.msra.mxu0 %v2135_v0 }
 0x457   :  { %2028 = vmatprep.subr.bf16.mxu0 %v2136_v1 }
 0x45a   :  { %2029 = vmatpush3.bf16.msra.mxu0 %v2136_v1 }
 0x50e   :  { %v1968_v33 = vpop.f32.mrb[32].mxu0 }
 0x50f   :  { %v939_v34 = vpop.f32.mrb[33].mxu0 }
 0x510   :  { %v1969_v35 = vpop.f32.mrb[34].mxu0 }
 0x511   :  { %v1003_v36 = vpack.c.bf16 %v1969_v35, %v1968_v33  ;;  %v942_v37 = vpop.f32.mrb[35].mxu0 }
 0x512   :  { %v1002_v38 = vpack.c.bf16 %v942_v37, %v939_v34 }
 0x514   :  { %1982 = vmatprep.subr.bf16.mxu1 %v1002_v38 }
 0x515   :  { %1983 = vmatpush3.bf16.msra.mxu1 %v1002_v38 }
 0x516   :  { %v1972_v39 = vpop.f32.mrb[36].mxu0  ;;  %1984 = vmatprep.subr.bf16.mxu1 %v1003_v36 }
 0x517   :  { %v955_v40 = vpop.f32.mrb[37].mxu0 }
 0x518   :  { %v1973_v41 = vpop.f32.mrb[38].mxu0 }
 0x519   :  { %v1005_v42 = vpack.c.bf16 %v1973_v41, %v1972_v39  ;;  %v958_v43 = vpop.f32.mrb[39].mxu0  ;;  %1985 = vmatpush3.bf16.msra.mxu1 %v1003_v36 }
 0x51a   :  { %v1004_v44 = vpack.c.bf16 %v958_v43, %v955_v40 }
 0x51c   :  { %1986 = vmatprep.subr.bf16.mxu1 %v1004_v44 }
 0x51d   :  { %1987 = vmatpush3.bf16.msra.mxu1 %v1004_v44 }
 0x51e   :  { %v1976_v45 = vpop.f32.mrb[40].mxu0  ;;  %1988 = vmatprep.subr.bf16.mxu1 %v1005_v42 }
 0x51f   :  { %v971_v46 = vpop.f32.mrb[41].mxu0 }
 0x520   :  { %v1977_v54 = vpop.f32.mrb[42].mxu0 }
 0x521   :  { %v1007_v55 = vpack.c.bf16 %v1977_v54, %v1976_v45  ;;  %v974_v57 = vpop.f32.mrb[43].mxu0  ;;  %1989 = vmatpush3.bf16.msra.mxu1 %v1005_v42 }
 0x522   :  { %v1006_v58 = vpack.c.bf16 %v974_v57, %v971_v46 }
 0x524   :  { %1990 = vmatprep.subr.bf16.mxu1 %v1006_v58 }
 0x525   :  { %1991 = vmatpush3.bf16.msra.mxu1 %v1006_v58 }
 0x526   :  { %v1980_v59 = vpop.f32.mrb[44].mxu0  ;;  %1992 = vmatprep.subr.bf16.mxu1 %v1007_v55 }
 0x527   :  { %v987_v60 = vpop.f32.mrb[45].mxu0 }
 0x528   :  { %v1981_v61 = vpop.f32.mrb[46].mxu0 }
 0x529   :  { %v1009_v56 = vpack.c.bf16 %v1981_v61, %v1980_v59  ;;  %v990_v62 = vpop.f32.mrb[47].mxu0  ;;  %1993 = vmatpush3.bf16.msra.mxu1 %v1007_v55 }
 0x52a   :  { %v1008_v63 = vpack.c.bf16 %v990_v62, %v987_v60 }
 0x52c   :  { %1994 = vmatprep.subr.bf16.mxu1 %v1008_v63 }
 0x52d   :  { %1995 = vmatpush3.bf16.msra.mxu1 %v1008_v63 }
 0x52e   :  { %1996 = vmatprep.subr.bf16.mxu1 %v1009_v56 }
 0x531   :  { %1997 = vmatpush3.bf16.msra.mxu1 %v1009_v56 }
 0x534   :  { %1999 = vmatmul.mubr.bf16.vlgmr.msra.gmra.mrb[32].mxu1 %v2545_v47 }
 0x535   :  { %2002 = vmatprep.mubr.bf16.mxu1 %v2547_v48 }
 0x53c   :  { %2003 = vmatmul.mubr.bf16.gmra.mrb[36].mxu1 %v2551_v49 }
 0x53d   :  { %2006 = vmatprep.mubr.bf16.mxu1 %v2553_v50 }
 0x544   :  { %2007 = vmatmul.mubr.bf16.gmra.mrb[40].mxu1 %v2557_v51 }
 0x545   :  { %2010 = vmatprep.mubr.bf16.mxu1 %v2559_v52 }
 0x54c   :  { %2011 = vmatmul.mubr.bf16.gmra.mrb[44].mxu1 %v2563_v53 }
 0x54d   :  { %2062 = vmatprep.mubr.bf16.mxu1 %v2542_v16 }
 0x607   :  { %v2000_v3 = vpop.f32.mrb[32].mxu1 }
 0x608   :  { %v1060_v4 = vadd.f32 %v2000_v3, %v1684_v2  ;;  %v1051_v5 = vpop.f32.mrb[33].mxu1 }
 0x609   :  { %v1052_v6 = vadd.f32 %v1684_v2, %v1051_v5  ;;  %v2001_v7 = vpop.f32.mrb[34].mxu1 }
 0x60a   :  { %v1063_v8 = vadd.f32 %v2001_v7, %v1684_v2  ;;  %v1054_v9 = vpop.f32.mrb[35].mxu1  ;;  %v1116_v11 = vmax.f32 %v1060_v4, 0.0 }
 0x60b   :  { %v1055_v10 = vadd.f32 %v1684_v2, %v1054_v9  ;;  %v1114_v12 = vmax.f32 %v1052_v6, 0.0 }
 0x60c   :  { %v1117_v16 = vmax.f32 %v1063_v8, 0.0 }
 0x60d   :  { %v1115_v13 = vmax.f32 %v1055_v10, 0.0 }
 0x60e   :  { %v1131_v14 = vpack.c.bf16 %v1117_v16, %v1116_v11 }
 0x60f   :  { %v1130_v15 = vpack.c.bf16 %v1115_v13, %v1114_v12  ;;  %v2004_v17 = vpop.f32.mrb[36].mxu1 }
 0x610   :  { %v1076_v18 = vadd.f32 %v2004_v17, %v1684_v2  ;;  %v1067_v19 = vpop.f32.mrb[37].mxu1 }
 0x611   :  { %v1068_v20 = vadd.f32 %v1684_v2, %v1067_v19  ;;  %v2005_v21 = vpop.f32.mrb[38].mxu1  ;;  %2030 = vmatprep.mubr.bf16.mxu0 %v1130_v15 }
 0x612   :  { %v1079_v22 = vadd.f32 %v2005_v21, %v1684_v2  ;;  %v1070_v23 = vpop.f32.mrb[39].mxu1  ;;  %2031 = vmatmul.mubr.bf16.vlgmr.msra.gmra.mrb[48].mxu0 %v1131_v14  ;;  %v1120_v25 = vmax.f32 %v1076_v18, 0.0 }
 0x613   :  { %v1071_v24 = vadd.f32 %v1684_v2, %v1070_v23  ;;  %v1118_v28 = vmax.f32 %v1068_v20, 0.0 }
 0x614   :  { %v1121_v27 = vmax.f32 %v1079_v22, 0.0 }
 0x615   :  { %v1119_v29 = vmax.f32 %v1071_v24, 0.0 }
 0x616   :  { %v1133_v30 = vpack.c.bf16 %v1121_v27, %v1120_v25  ;;  %v1411_v27 = vlaneseq }
 0x617   :  { %v1132_v31 = vpack.c.bf16 %v1119_v29, %v1118_v28  ;;  %v2008_v26 = vpop.f32.mrb[40].mxu1  ;;  %v1693_v29 = vld [vmem:[%s2778_s9] ss:$0 sm:$0xff]  ;;  %s2373_s9 = smov [#allocation13]  }
 0x618   :  { %v1092_v32 = vadd.f32 %v2008_v26, %v1684_v2  ;;  %v1083_v33 = vpop.f32.mrb[41].mxu1  ;;  %v2599_v28 = vand.u32 127, %v1411_v27  ;;  %s1627_s28 = sshll.u32 %s2373_s9, 4  ;;  %s1628_s28 = int_to_ptr.vmem [resolvable:$true] %s1627_s28 }
 0x619   :  { %v1084_v34 = vadd.f32 %v1684_v2, %v1083_v33  ;;  %v2009_v35 = vpop.f32.mrb[42].mxu1  ;;  %2034 = vmatprep.mubr.bf16.mxu0 %v1132_v31  ;;  %s2333_s29 = scalar_lea.vmem %s1628_s28, 2048  ;;  %p2338_p7 = scmp.lt.s32.totalorder %s1628_s28, %s1628_s28 }
 0x61a   :  { %v1095_v36 = vadd.f32 %v2009_v35, %v1684_v2  ;;  %v1086_v37 = vpop.f32.mrb[43].mxu1  ;;  %2035 = vmatmul.mubr.bf16.gmra.mrb[52].mxu0 %v1133_v30  ;;  %v1124_v39 = vmax.f32 %v1092_v32, 0.0  ;;  %vm1413_vm0 = vcmp.lt.s32.totalorder %v2599_v28, 8  ;;  %p2334_p6 = scmp.ne.s32.totalorder %s1628_s28, %s2333_s29  ;;  %p2339_p8 = scmp.lt.s32.totalorder %s2333_s29, %s2333_s29 }
 0x61b   :  { %v1087_v38 = vadd.f32 %v1684_v2, %v1086_v37  ;;  %v1122_v41 = vmax.f32 %v1084_v34, 0.0 }
 0x61c   :  { %v1125_v40 = vmax.f32 %v1095_v36, 0.0  ;;  %p2340_p9 = por %p2339_p8, %p2338_p7 }
 0x61d   :  { %v1123_v42 = vmax.f32 %v1087_v38, 0.0 }
 0x61e   :  { %v1135_v43 = vpack.c.bf16 %v1125_v40, %v1124_v39  ;;  %p2341_p10 = pnand %p2340_p9, %p2334_p6 }
 0x61f   :  { %v1134_v44 = vpack.c.bf16 %v1123_v42, %v1122_v41  ;;  %v2012_v45 = vpop.f32.mrb[44].mxu1 }
 0x620   :  { %v1108_v46 = vadd.f32 %v2012_v45, %v1684_v2  ;;  %v1099_v54 = vpop.f32.mrb[45].mxu1 }
 0x621   :  { %v1100_v55 = vadd.f32 %v1684_v2, %v1099_v54  ;;  %v2013_v57 = vpop.f32.mrb[46].mxu1  ;;  %2038 = vmatprep.mubr.bf16.mxu0 %v1134_v44 }
 0x622   :  { %v1111_v58 = vadd.f32 %v2013_v57, %v1684_v2  ;;  %v1102_v59 = vpop.f32.mrb[47].mxu1  ;;  %2039 = vmatmul.mubr.bf16.gmra.mrb[56].mxu0 %v1135_v43  ;;  %v1128_v61 = vmax.f32 %v1108_v46, 0.0 }
 0x623   :  { %v1103_v60 = vadd.f32 %v1684_v2, %v1102_v59  ;;  %v1126_v62 = vmax.f32 %v1100_v55, 0.0 }
 0x624   :  { %v1129_v56 = vmax.f32 %v1111_v58, 0.0 }
 0x625   :  { %v1127_v63 = vmax.f32 %v1103_v60, 0.0 }
 0x626   :  { %v1137_v0 = vpack.c.bf16 %v1129_v56, %v1128_v61 }
 0x627   :  { %v1136_v1 = vpack.c.bf16 %v1127_v63, %v1126_v62 }
 0x629   :  { %2042 = vmatprep.mubr.bf16.mxu0 %v1136_v1 }
 0x62a   :  { %2043 = vmatmul.mubr.bf16.gmra.mrb[60].mxu0 %v1137_v0 }
 0x6e5   :  { %v2032_v3 = vpop.f32.mrb[48].mxu0 }
 0x6e6   :  { %v1236_v4 = vpop.f32.mrb[49].mxu0 }
 0x6e7   :  { %v2033_v5 = vpop.f32.mrb[50].mxu0 }
 0x6e8   :  { %v1300_v6 = vpack.c.bf16 %v2033_v5, %v2032_v3  ;;  %v1239_v7 = vpop.f32.mrb[51].mxu0 }
 0x6e9   :  { %v1299_v8 = vpack.c.bf16 %v1239_v7, %v1236_v4 }
 0x6eb   :  { %2046 = vmatprep.subr.bf16.mxu1 %v1299_v8 }
 0x6ec   :  { %2047 = vmatpush3.bf16.msra.mxu1 %v1299_v8 }
 0x6ed   :  { %v2036_v9 = vpop.f32.mrb[52].mxu0  ;;  %2048 = vmatprep.subr.bf16.mxu1 %v1300_v6 }
 0x6ee   :  { %v1252_v10 = vpop.f32.mrb[53].mxu0 }
 0x6ef   :  { %v2037_v2 = vpop.f32.mrb[54].mxu0 }
 0x6f0   :  { %v1302_v11 = vpack.c.bf16 %v2037_v2, %v2036_v9  ;;  %v1255_v16 = vpop.f32.mrb[55].mxu0  ;;  %2049 = vmatpush3.bf16.msra.mxu1 %v1300_v6 }
 0x6f1   :  { %v1301_v12 = vpack.c.bf16 %v1255_v16, %v1252_v10 }
 0x6f3   :  { %2050 = vmatprep.subr.bf16.mxu1 %v1301_v12 }
 0x6f4   :  { %2051 = vmatpush3.bf16.msra.mxu1 %v1301_v12 }
 0x6f5   :  { %v2040_v13 = vpop.f32.mrb[56].mxu0  ;;  %2052 = vmatprep.subr.bf16.mxu1 %v1302_v11 }
 0x6f6   :  { %v1268_v14 = vpop.f32.mrb[57].mxu0 }
 0x6f7   :  { %v2041_v15 = vpop.f32.mrb[58].mxu0 }
 0x6f8   :  { %v1304_v17 = vpack.c.bf16 %v2041_v15, %v2040_v13  ;;  %v1271_v18 = vpop.f32.mrb[59].mxu0  ;;  %2053 = vmatpush3.bf16.msra.mxu1 %v1302_v11 }
 0x6f9   :  { %v1303_v19 = vpack.c.bf16 %v1271_v18, %v1268_v14 }
 0x6fb   :  { %2054 = vmatprep.subr.bf16.mxu1 %v1303_v19 }
 0x6fc   :  { %2055 = vmatpush3.bf16.msra.mxu1 %v1303_v19 }
 0x6fd   :  { %v2044_v20 = vpop.f32.mrb[60].mxu0  ;;  %2056 = vmatprep.subr.bf16.mxu1 %v1304_v17 }
 0x6fe   :  { %v1284_v21 = vpop.f32.mrb[61].mxu0 }
 0x6ff   :  { %v2045_v22 = vpop.f32.mrb[62].mxu0 }
 0x700   :  { %v1306_v23 = vpack.c.bf16 %v2045_v22, %v2044_v20  ;;  %v1287_v24 = vpop.f32.mrb[63].mxu0  ;;  %2057 = vmatpush3.bf16.msra.mxu1 %v1304_v17 }
 0x701   :  { %v1305_v25 = vpack.c.bf16 %v1287_v24, %v1284_v21 }
 0x703   :  { %2058 = vmatprep.subr.bf16.mxu1 %v1305_v25 }
 0x704   :  { %2059 = vmatpush3.bf16.msra.mxu1 %v1305_v25 }
 0x705   :  { %2060 = vmatprep.subr.bf16.mxu1 %v1306_v23 }
 0x708   :  { %2061 = vmatpush3.bf16.msra.mxu1 %v1306_v23 }
 0x70b   :  { %2063 = vmatmul.mubr.bf16.vlgmr.msra.gmra.mrb[48].mxu1 %v2545_v47 }
 0x70c   :  { %2066 = vmatprep.mubr.bf16.mxu1 %v2547_v48 }
 0x713   :  { %2067 = vmatmul.mubr.bf16.gmra.mrb[52].mxu1 %v2551_v49 }
 0x714   :  { %2070 = vmatprep.mubr.bf16.mxu1 %v2553_v50 }
 0x71b   :  { %2071 = vmatmul.mubr.bf16.gmra.mrb[56].mxu1 %v2557_v51 }
 0x71c   :  { %2074 = vmatprep.mubr.bf16.mxu1 %v2559_v52 }
 0x723   :  { %2075 = vmatmul.mubr.bf16.gmra.mrb[60].mxu1 %v2563_v53 }
 0x7de   :  { %v2064_v47 = vpop.f32.mrb[48].mxu1 }
 0x7df   :  { %v1357_v48 = vadd.f32 %v2064_v47, %v1693_v29  ;;  %v1348_v49 = vpop.f32.mrb[49].mxu1 }
 0x7e0   :  { %v1349_v30 = vadd.f32 %v1693_v29, %v1348_v49  ;;  %v2065_v50 = vpop.f32.mrb[50].mxu1 }
 0x7e1   :  { %v1360_v31 = vadd.f32 %v2065_v50, %v1693_v29  ;;  %v1351_v51 = vpop.f32.mrb[51].mxu1  ;;  %v1416_v52 = vsel %vm1413_vm0, %v1357_v48, -1e+30 }
 0x7e2   :  { %v1352_v53 = vadd.f32 %v1693_v29, %v1351_v51  ;;  %1434 = vmax.xlane.f32.xlu1 %v1416_v52  ;;  %v1414_v26 = vsel %vm1413_vm0, %v1349_v30, -1e+30 }
 0x7e3   :  { %1430 = vmax.xlane.f32.xlu0 %v1414_v26  ;;  %v1417_v32 = vsel %vm1413_vm0, %v1360_v31, -1e+30 }
 0x7e4   :  { %v1415_v34 = vsel %vm1413_vm0, %v1352_v53, -1e+30 }
 0x7e6   :  { %1436 = vmax.xlane.f32.xlu1 %v1417_v32  ;;  %v2068_v33 = vpop.f32.mrb[52].mxu1 }
 0x7e7   :  { %v1373_v35 = vadd.f32 %v2068_v33, %v1693_v29  ;;  %v1364_v36 = vpop.f32.mrb[53].mxu1  ;;  %1432 = vmax.xlane.f32.xlu0 %v1415_v34 }
 0x7e8   :  { %v2069_v37 = vpop.f32.mrb[54].mxu1  ;;  %v1365_v41 = vadd.f32 %v1693_v29, %v1364_v36 }
 0x7e9   :  { %v1376_v38 = vadd.f32 %v2069_v37, %v1693_v29  ;;  %v1367_v39 = vpop.f32.mrb[55].mxu1  ;;  %v1420_v40 = vsel %vm1413_vm0, %v1373_v35, -1e+30 }
 0x7ea   :  { %v1368_v42 = vadd.f32 %v1693_v29, %v1367_v39  ;;  %v1418_v45 = vsel %vm1413_vm0, %v1365_v41, -1e+30 }
 0x7eb   :  { %1442 = vmax.xlane.f32.xlu0 %v1420_v40  ;;  %v1421_v43 = vsel %vm1413_vm0, %v1376_v38, -1e+30 }
 0x7ec   :  { %1444 = vmax.xlane.f32.xlu1 %v1421_v43  ;;  %v1419_v55 = vsel %vm1413_vm0, %v1368_v42, -1e+30 }
 0x7ee   :  { %v2072_v44 = vpop.f32.mrb[56].mxu1 }
 0x7ef   :  { %v1389_v46 = vadd.f32 %v2072_v44, %v1693_v29  ;;  %v1380_v54 = vpop.f32.mrb[57].mxu1  ;;  %1438 = vmax.xlane.f32.xlu0 %v1418_v45 }
 0x7f0   :  { %v2073_v57 = vpop.f32.mrb[58].mxu1  ;;  %1440 = vmax.xlane.f32.xlu1 %v1419_v55  ;;  %v1381_v61 = vadd.f32 %v1693_v29, %v1380_v54 }
 0x7f1   :  { %v1392_v58 = vadd.f32 %v2073_v57, %v1693_v29  ;;  %v1383_v59 = vpop.f32.mrb[59].mxu1  ;;  %v1424_v60 = vsel %vm1413_vm0, %v1389_v46, -1e+30 }
 0x7f2   :  { %v1384_v56 = vadd.f32 %v1693_v29, %v1383_v59  ;;  %v2627_v0 = vsel %vm1413_vm0, %v1381_v61, -1e+30 }
 0x7f3   :  { %1450 = vmax.xlane.f32.xlu0 %v1424_v60  ;;  %v1425_v62 = vsel %vm1413_vm0, %v1392_v58, -1e+30 }
 0x7f4   :  { %1452 = vmax.xlane.f32.xlu1 %v1425_v62  ;;  %v2632_v3 = vsel %vm1413_vm0, %v1384_v56, -1e+30 }
 0x7f6   :  { %v2076_v63 = vpop.f32.mrb[60].mxu1 }
 0x7f7   :  { %v1396_v1 = vpop.f32.mrb[61].mxu1  ;;  %1446 = vmax.xlane.f32.xlu0 %v2627_v0  ;;  %v1405_v7 = vadd.f32 %v2076_v63, %v1693_v29 }
 0x7f8   :  { %v1397_v4 = vadd.f32 %v1693_v29, %v1396_v1  ;;  %v2077_v5 = vpop.f32.mrb[62].mxu1  ;;  %1448 = vmax.xlane.f32.xlu1 %v2632_v3 }
 0x7f9   :  { %v1399_v6 = vpop.f32.mrb[63].mxu1  ;;  %v1408_v10 = vadd.f32 %v2077_v5, %v1693_v29  ;;  %v2647_v11 = vsel %vm1413_vm0, %v1405_v7, -1e+30 }
 0x7fa   :  { %v1400_v8 = vadd.f32 %v1693_v29, %v1399_v6  ;;  %v2637_v9 = vsel %vm1413_vm0, %v1397_v4, -1e+30 }
 0x7fb   :  { %1454 = vmax.xlane.f32.xlu0 %v2637_v9  ;;  %v2652_v16 = vsel %vm1413_vm0, %v1408_v10, -1e+30 }
 0x7fc   :  { %v2642_v2 = vsel %vm1413_vm0, %v1400_v8, -1e+30 }
 0x7fd   :  { %1456 = vmax.xlane.f32.xlu1 %v2642_v2 }
 0x7ff   :  { %1458 = vmax.xlane.f32.xlu0 %v2647_v11 }
 0x801   :  { %1460 = vmax.xlane.f32.xlu1 %v2652_v16 }
 0x86f   :  { %v1435_v12 = vpop.xlane.xlu1 %1434 }
 0x870   :  { %v2655_v13 = vsub.f32 %v1416_v52, %v1435_v12  ;;  %v1431_v14 = vpop.xlane.xlu0 %1430 }
 0x871   :  { %v2657_v15 = vsub.f32 %v1414_v26, %v1431_v14 }
 0x872   :  { %v1482_v17 = vmul.f32 1.442695, %v2655_v13 }
 0x873   :  { %v1478_v18 = vmul.f32 1.442695, %v2657_v15  ;;  %v1437_v19 = vpop.xlane.xlu1 %1436 }
 0x874   :  { %2137 = vpow2.f32 %v1482_v17  ;;  %v2661_v20 = vsub.f32 %v1417_v32, %v1437_v19  ;;  %v1433_v21 = vpop.xlane.xlu0 %1432 }
 0x875   :  { %v2663_v22 = vsub.f32 %v1415_v34, %v1433_v21  ;;  %2139 = vpow2.f32 %v1478_v18 }
 0x876   :  { %v1484_v23 = vmul.f32 1.442695, %v2661_v20 }
 0x877   :  { %v1480_v24 = vmul.f32 1.442695, %v2663_v22 }
 0x878   :  { %2141 = vpow2.f32 %v1484_v23  ;;  %v1443_v25 = vpop.xlane.xlu0 %1442 }
 0x879   :  { %v2667_v27 = vsub.f32 %v1420_v40, %v1443_v25  ;;  %v1445_v29 = vpop.xlane.xlu1 %1444  ;;  %2143 = vpow2.f32 %v1480_v24 }
 0x87a   :  { %v2669_v47 = vsub.f32 %v1421_v43, %v1445_v29 }
 0x87b   :  { %v1490_v48 = vmul.f32 1.442695, %v2667_v27 }
 0x87c   :  { %v1492_v49 = vmul.f32 1.442695, %v2669_v47  ;;  %v1439_v30 = vpop.xlane.xlu0 %1438 }
 0x87d   :  { %2145 = vpow2.f32 %v1490_v48  ;;  %v2673_v50 = vsub.f32 %v1418_v45, %v1439_v30  ;;  %v1441_v31 = vpop.xlane.xlu1 %1440 }
 0x87e   :  { %v2138_v51 = vpop.eup %2137  ;;  %2147 = vpow2.f32 %v1492_v49  ;;  %v2675_v52 = vsub.f32 %v1419_v55, %v1441_v31 }
 0x87f   :  { %v1486_v53 = vmul.f32 1.442695, %v2673_v50  ;;  %v1512_v26 = vsel %vm1413_vm0, %v2138_v51, 0.0  ;;  %v2140_v32 = vpop.eup %2139 }
 0x880   :  { %v1488_v33 = vmul.f32 1.442695, %v2675_v52  ;;  %1530 = vadd.xlane.f32.xlu0 %v1512_v26  ;;  %v1451_v34 = vpop.xlane.xlu0 %1450  ;;  %v1510_v41 = vsel %vm1413_vm0, %v2140_v32, 0.0 }
 0x881   :  { %2149 = vpow2.f32 %v1486_v53  ;;  %v2681_v35 = vsub.f32 %v1424_v60, %v1451_v34  ;;  %v1453_v36 = vpop.xlane.xlu1 %1452 }
 0x882   :  { %v2142_v37 = vpop.eup %2141  ;;  %2151 = vpow2.f32 %v1488_v33  ;;  %v2683_v38 = vsub.f32 %v1425_v62, %v1453_v36 }
 0x883   :  { %v1498_v39 = vmul.f32 1.442695, %v2681_v35  ;;  %v1513_v40 = vsel %vm1413_vm0, %v2142_v37, 0.0  ;;  %v2144_v42 = vpop.eup %2143 }
 0x884   :  { %v1500_v43 = vmul.f32 1.442695, %v2683_v38  ;;  %1532 = vadd.xlane.f32.xlu1 %v1513_v40  ;;  %1526 = vadd.xlane.f32.xlu0 %v1510_v41  ;;  %v1447_v44 = vpop.xlane.xlu0 %1446  ;;  %v1511_v58 = vsel %vm1413_vm0, %v2144_v42, 0.0 }
 0x885   :  { %2153 = vpow2.f32 %v1498_v39  ;;  %v2692_v45 = vsub.f32 %v2627_v0, %v1447_v44  ;;  %v1449_v46 = vpop.xlane.xlu1 %1448 }
 0x886   :  { %2155 = vpow2.f32 %v1500_v43  ;;  %v2695_v54 = vsub.f32 %v2632_v3, %v1449_v46 }
 0x887   :  { %v2146_v55 = vpop.eup %2145  ;;  %v1494_v57 = vmul.f32 1.442695, %v2692_v45 }
 0x888   :  { %v2148_v59 = vpop.eup %2147  ;;  %v1496_v60 = vmul.f32 1.442695, %v2695_v54  ;;  %1528 = vadd.xlane.f32.xlu1 %v1511_v58  ;;  %v1455_v61 = vpop.xlane.xlu0 %1454  ;;  %v1516_v56 = vsel %vm1413_vm0, %v2146_v55, 0.0 }
 0x889   :  { %2157 = vpow2.f32 %v1494_v57  ;;  %v2704_v62 = vsub.f32 %v2637_v9, %v1455_v61  ;;  %1538 = vadd.xlane.f32.xlu0 %v1516_v56  ;;  %v1517_v4 = vsel %vm1413_vm0, %v2148_v59, 0.0 }
 0x88a   :  { %2159 = vpow2.f32 %v1496_v60  ;;  %v1457_v63 = vpop.xlane.xlu1 %1456 }
 0x88b   :  { %v2150_v0 = vpop.eup %2149  ;;  %v1502_v1 = vmul.f32 1.442695, %v2704_v62  ;;  %v2708_v3 = vsub.f32 %v2642_v2, %v1457_v63 }
 0x88c   :  { %v2152_v5 = vpop.eup %2151  ;;  %1540 = vadd.xlane.f32.xlu1 %v1517_v4  ;;  %v1459_v6 = vpop.xlane.xlu0 %1458  ;;  %v1514_v7 = vsel %vm1413_vm0, %v2150_v0, 0.0 }
 0x88d   :  { %2161 = vpow2.f32 %v1502_v1  ;;  %v1504_v8 = vmul.f32 1.442695, %v2708_v3  ;;  %v2716_v9 = vsub.f32 %v2647_v11, %v1459_v6  ;;  %1534 = vadd.xlane.f32.xlu0 %v1514_v7  ;;  %v1515_v17 = vsel %vm1413_vm0, %v2152_v5, 0.0 }
 0x88e   :  { %v1461_v10 = vpop.xlane.xlu1 %1460 }
 0x88f   :  { %v2154_v12 = vpop.eup %2153  ;;  %2163 = vpow2.f32 %v1504_v8  ;;  %v1506_v2 = vmul.f32 1.442695, %v2716_v9  ;;  %v2720_v14 = vsub.f32 %v2652_v16, %v1461_v10 }
 0x890   :  { %v2156_v18 = vpop.eup %2155  ;;  %1536 = vadd.xlane.f32.xlu1 %v1515_v17  ;;  %v1520_v19 = vsel %vm1413_vm0, %v2154_v12, 0.0 }
 0x891   :  { %2165 = vpow2.f32 %v1506_v2  ;;  %v1508_v11 = vmul.f32 1.442695, %v2720_v14  ;;  %1546 = vadd.xlane.f32.xlu0 %v1520_v19  ;;  %v1521_v23 = vsel %vm1413_vm0, %v2156_v18, 0.0 }
 0x893   :  { %v2158_v21 = vpop.eup %2157  ;;  %2167 = vpow2.f32 %v1508_v11 }
 0x894   :  { %v2160_v24 = vpop.eup %2159  ;;  %1548 = vadd.xlane.f32.xlu1 %v1521_v23  ;;  %v1518_v16 = vsel %vm1413_vm0, %v2158_v21, 0.0 }
 0x895   :  { %1542 = vadd.xlane.f32.xlu0 %v1518_v16  ;;  %v1519_v29 = vsel %vm1413_vm0, %v2160_v24, 0.0 }
 0x897   :  { %v2162_v25 = vpop.eup %2161 }
 0x898   :  { %1544 = vadd.xlane.f32.xlu1 %v1519_v29  ;;  %v1522_v48 = vsel %vm1413_vm0, %v2162_v25, 0.0 }
 0x899   :  { %v2164_v49 = vpop.eup %2163  ;;  %1550 = vadd.xlane.f32.xlu0 %v1522_v48 }
 0x89a   :  { %v1523_v30 = vsel %vm1413_vm0, %v2164_v49, 0.0 }
 0x89b   :  { %v2166_v31 = vpop.eup %2165 }
 0x89c   :  { %1552 = vadd.xlane.f32.xlu1 %v1523_v30  ;;  %v1524_v51 = vsel %vm1413_vm0, %v2166_v31, 0.0 }
 0x89d   :  { %v2168_v53 = vpop.eup %2167  ;;  %1554 = vadd.xlane.f32.xlu0 %v1524_v51 }
 0x89e   :  { %v1525_v26 = vsel %vm1413_vm0, %v2168_v53, 0.0 }
 0x8a0   :  { %1556 = vadd.xlane.f32.xlu1 %v1525_v26 }
 0x90d   :  { %v1531_v32 = vpop.xlane.xlu0 %1530 }
 0x90e   :  { %2169 = vlog2.f32 %v1531_v32 }
 0x911   :  { %v1533_v33 = vpop.xlane.xlu1 %1532  ;;  %v1527_v34 = vpop.xlane.xlu0 %1526 }
 0x912   :  { %2171 = vlog2.f32 %v1533_v33 }
 0x913   :  { %2173 = vlog2.f32 %v1527_v34 }
 0x915   :  { %v1529_v36 = vpop.xlane.xlu1 %1528 }
 0x916   :  { %2175 = vlog2.f32 %v1529_v36  ;;  %v1539_v37 = vpop.xlane.xlu0 %1538 }
 0x917   :  { %2177 = vlog2.f32 %v1539_v37 }
 0x918   :  { %v2170_v39 = vpop.eup %2169 }
 0x919   :  { %v1563_v40 = vmul.f32 0.6931472, %v2170_v39  ;;  %v1541_v41 = vpop.xlane.xlu1 %1540 }
 0x91a   :  { %2179 = vlog2.f32 %v1541_v41  ;;  %v1535_v42 = vpop.xlane.xlu0 %1534 }
 0x91b   :  { %v1592_v43 = vsub.f32 %v2655_v13, %v1563_v40  ;;  %2181 = vlog2.f32 %v1535_v42 }
 0x91c   :  { %v2172_v28 = vpop.eup %2171 }
 0x91d   :  { %v2174_v44 = vpop.eup %2173  ;;  %1608 = vst [vmem:[#allocation13 + $0x10] sm:$0xff] %v1592_v43  ;;  %v1565_v46 = vmul.f32 0.6931472, %v2172_v28  ;;  %v1537_v55 = vpop.xlane.xlu1 %1536 }
 0x91e   :  { %v1559_v57 = vmul.f32 0.6931472, %v2174_v44  ;;  %2183 = vlog2.f32 %v1537_v55  ;;  %v1547_v58 = vpop.xlane.xlu0 %1546 }
 0x91f   :  { %v1593_v59 = vsub.f32 %v2661_v20, %v1565_v46  ;;  %2185 = vlog2.f32 %v1547_v58 }
 0x920   :  { %v2176_v60 = vpop.eup %2175  ;;  %v1590_v61 = vsub.f32 %v2657_v15, %v1559_v57 }
 0x921   :  { %v2178_v56 = vpop.eup %2177  ;;  %1609 = vst [vmem:[#allocation13 + $0x18] sm:$0xff] %v1593_v59  ;;  %v1561_v63 = vmul.f32 0.6931472, %v2176_v60  ;;  %v1549_v0 = vpop.xlane.xlu1 %1548 }
 0x922   :  { %1606 = vst [vmem:[#allocation13] sm:$0xff] %v1590_v61  ;;  %v1571_v13 = vmul.f32 0.6931472, %v2178_v56  ;;  %2187 = vlog2.f32 %v1549_v0  ;;  %v1543_v1 = vpop.xlane.xlu0 %1542 }
 0x923   :  { %v1591_v4 = vsub.f32 %v2663_v22, %v1561_v63  ;;  %2189 = vlog2.f32 %v1543_v1 }
 0x924   :  { %v2180_v5 = vpop.eup %2179  ;;  %v1596_v6 = vsub.f32 %v2667_v27, %v1571_v13 }
 0x925   :  { %v2182_v7 = vpop.eup %2181  ;;  %1607 = vst [vmem:[#allocation13 + $0x8] sm:$0xff] %v1591_v4  ;;  %v1573_v20 = vmul.f32 0.6931472, %v2180_v5  ;;  %v1545_v8 = vpop.xlane.xlu1 %1544 }
 0x926   :  { %1612 = vst [vmem:[#allocation13 + $0x30] sm:$0xff] %v1596_v6  ;;  %v1567_v15 = vmul.f32 0.6931472, %v2182_v7  ;;  %2191 = vlog2.f32 %v1545_v8  ;;  %v1551_v10 = vpop.xlane.xlu0 %1550 }
 0x927   :  { %v1597_v12 = vsub.f32 %v2669_v47, %v1573_v20  ;;  %2193 = vlog2.f32 %v1551_v10 }
 0x928   :  { %v2184_v2 = vpop.eup %2183  ;;  %v1594_v17 = vsub.f32 %v2673_v50, %v1567_v15 }
 0x929   :  { %v2186_v18 = vpop.eup %2185  ;;  %1613 = vst [vmem:[#allocation13 + $0x38] sm:$0xff] %v1597_v12  ;;  %v1569_v22 = vmul.f32 0.6931472, %v2184_v2  ;;  %v1553_v19 = vpop.xlane.xlu1 %1552 }
 0x92a   :  { %1610 = vst [vmem:[#allocation13 + $0x20] sm:$0xff] %v1594_v17  ;;  %v1579_v27 = vmul.f32 0.6931472, %v2186_v18  ;;  %2195 = vlog2.f32 %v1553_v19  ;;  %v1555_v11 = vpop.xlane.xlu0 %1554 }
 0x92b   :  { %v1595_v21 = vsub.f32 %v2675_v52, %v1569_v22  ;;  %2197 = vlog2.f32 %v1555_v11 }
 0x92c   :  { %v2188_v23 = vpop.eup %2187  ;;  %v1600_v24 = vsub.f32 %v2681_v35, %v1579_v27 }
 0x92d   :  { %v2190_v16 = vpop.eup %2189  ;;  %1611 = vst [vmem:[#allocation13 + $0x28] sm:$0xff] %v1595_v21  ;;  %v1581_v47 = vmul.f32 0.6931472, %v2188_v23  ;;  %v1557_v25 = vpop.xlane.xlu1 %1556 }
 0x92e   :  { %1616 = vst [vmem:[#allocation13 + $0x50] sm:$0xff] %v1600_v24  ;;  %v1575_v50 = vmul.f32 0.6931472, %v2190_v16  ;;  %2199 = vlog2.f32 %v1557_v25 }
 0x92f   :  { %v1601_v29 = vsub.f32 %v2683_v38, %v1581_v47 }
 0x930   :  { %v2192_v48 = vpop.eup %2191  ;;  %v1598_v49 = vsub.f32 %v2692_v45, %v1575_v50 }
 0x931   :  { %v2194_v30 = vpop.eup %2193  ;;  %1617 = vst [vmem:[#allocation13 + $0x58] sm:$0xff] %v1601_v29  ;;  %v1577_v31 = vmul.f32 0.6931472, %v2192_v48 }
 0x932   :  { %1614 = vst [vmem:[#allocation13 + $0x40] sm:$0xff] %v1598_v49  ;;  %v1583_v52 = vmul.f32 0.6931472, %v2194_v30 }
 0x933   :  { %v1599_v51 = vsub.f32 %v2695_v54, %v1577_v31 }
 0x934   :  { %v2196_v35 = vpop.eup %2195  ;;  %v1602_v53 = vsub.f32 %v2704_v62, %v1583_v52 }
 0x935   :  { %v2198_v26 = vpop.eup %2197  ;;  %1615 = vst [vmem:[#allocation13 + $0x48] sm:$0xff] %v1599_v51  ;;  %v1585_v32 = vmul.f32 0.6931472, %v2196_v35 }
 0x936   :  { %1618 = vst [vmem:[#allocation13 + $0x60] sm:$0xff] %v1602_v53  ;;  %v1587_v33 = vmul.f32 0.6931472, %v2198_v26 }
 0x937   :  { %v1603_v38 = vsub.f32 %v2708_v3, %v1585_v32 }
 0x938   :  { %v2200_v34 = vpop.eup %2199  ;;  %v1604_v45 = vsub.f32 %v2716_v9, %v1587_v33 }
 0x939   :  { %1619 = vst [vmem:[#allocation13 + $0x68] sm:$0xff] %v1603_v38  ;;  %v1589_v36 = vmul.f32 0.6931472, %v2200_v34 }
 0x93a   :  { %1620 = vst [vmem:[#allocation13 + $0x70] sm:$0xff] %v1604_v45 }
 0x93b   :  { %v1605_v54 = vsub.f32 %v2720_v14, %v1589_v36 }
 0x93d   :  { %1621 = vst [vmem:[#allocation13 + $0x78] sm:$0xff] %v1605_v54 }
 0x93e   :  { %2344 = shalt.err (!%p2341_p10)
}
 0x93f   :  { %s2345_s4 = scalar_lea.hbm %s2779_s10, 2048 }
 0x940   :  { %p2346_p11 = scmp.ne.s32.totalorder %s2779_s10, %s2345_s4  ;;  %p2349_p12 = scmp.lt.u32.totalorder %s2345_s4, %s2779_s10 }
 0x942   :  { %p2351_p13 = pnand %p2349_p12, %p2346_p11 }
 0x944   :  { %2354 = shalt.err (!%p2351_p13)
}
 0x945   :  { %s2374_s22 = smov 128   ;;  %s2375_s15 = smov 8  }
 0x946   :  { %1633 = dma.vmem_to_hbm [thread:$0]  %s1628_s28, 2048, %s2779_s10, [#allocation4], %s2374_s22, %s2374_s22, %s2375_s15  }
 0x947   :  { %2363 = dma.done.wait [#allocation4], 2048  }
 0x948   :  { %2364 = vsyncadd [#allocation4], 4294965248 }
 0x949   :  { %1637 = vsyncpa [#allocation3], 1 }
 0x94a   :  { %1638 = vsyncpa [#allocation6], 1 }
 0x94b   :  { %1639 = vsyncpa [#allocation9], 1 }
 0x94c   :  { %1640 = vsyncpa [#allocation12], 1 }
 0x94d   :  { %1641 = vsyncpa [#allocation4], 1 }

</bundles_post_ra>
